<compile_context>
chip_gen: v6e
topology: v6e:2x2x1
jax: 0.10.0
libtpu: 0.0.40
codegen_flags: <defaults>
</compile_context>

<pallas_src>
import functools

import jax
import jax.numpy as jnp
from jax import lax
from jax.experimental import pallas as pl
from jax.experimental.pallas import tpu as pltpu

LN_EPS = 1e-5  # nn.LayerNorm default


def _round_up(x, m):
    return (x + m - 1) // m * m


def _vmem_capacity_bytes():
    try:
        return int(pltpu.get_tpu_info().vmem_capacity_bytes)
    except Exception:
        return 64 * 1024 * 1024  # conservative (v7x per-TensorCore)


def _layer_norm(x, gamma, beta):
    # x: (TM, D) f32, gamma/beta: (1, D) f32
    mean = jnp.mean(x, axis=-1, keepdims=True)
    xc = x - mean
    var = jnp.mean(xc * xc, axis=-1, keepdims=True)
    inv = jax.lax.rsqrt(var + LN_EPS)
    return xc * inv * gamma + beta


def _gelu(x):
    # TODO(synk): PyTorch F.gelu default is the exact erf form; Mosaic lowers
    # tanh natively (EUP) so the tanh approximation is used (max abs err ~1e-3).
    # TODO(synk): on v6e/v7x this could run in bf16 (bf16 VPU/EUP) to halve the
    # elementwise work on the (TM, hidden_chunk) intermediate; kept f32 so the
    # same code path is also optimal on v5e (no bf16 VPU/EUP).
    c = jnp.float32(0.7978845608028654)  # sqrt(2/pi)
    return 0.5 * x * (1.0 + jnp.tanh(c * (x + 0.044715 * x * x * x)))


def _block_kernel(x_ref,
                  ln1g_ref, ln1b_ref,
                  wmix_ref, bmix_ref,
                  ln2g_ref, ln2b_ref,
                  w1_ref, b1_ref,
                  w2_ref, b2_ref,
                  h_out_ref, res_out_ref,
                  *, hidden_chunk):
    x = x_ref[...].astype(jnp.float32)                      # (TM, D) f32

    # Hoist small parameter reads once (JAX does not CSE broadcast_in_dim).
    ln1_g = ln1g_ref[...]
    ln1_b = ln1b_ref[...]
    ln2_g = ln2g_ref[...]
    ln2_b = ln2b_ref[...]
    b_mix = bmix_ref[...]
    b_fc2 = b2_ref[...]

    # dropout1 / drop_path1 have p=0 -> identity; residual is None (first block)
    residual = x

    # norm1 -> mixer (Linear stand-in); MXU fed bf16, accumulate f32
    h = _layer_norm(residual, ln1_g, ln1_b)
    h = jnp.dot(h.astype(jnp.bfloat16), wmix_ref[...],
                preferred_element_type=jnp.float32) + b_mix

    # dropout2 / drop_path2 p=0 -> identity; residual stream kept in f32
    residual = h + residual
    res_out_ref[...] = residual.astype(res_out_ref.dtype)

    # norm2 -> MLP (fc1 -> gelu -> fc2), chunked over the hidden dim so the
    # (TM, H) f32 intermediate never exceeds (TM, hidden_chunk).
    h = _layer_norm(residual, ln2_g, ln2_b)
    h_bf = h.astype(jnp.bfloat16)

    tm, d = x.shape
    hid = w1_ref.shape[1]
    n_chunks = hid // hidden_chunk
    acc = jnp.zeros((tm, d), jnp.float32)

    if n_chunks <= 4:
        for c in range(n_chunks):                    # static, small trip count
            lo = c * hidden_chunk
            hi = lo + hidden_chunk
            y = jnp.dot(h_bf, w1_ref[:, lo:hi],
                        preferred_element_type=jnp.float32) + b1_ref[:, lo:hi]
            y = _gelu(y)
            acc = acc + jnp.dot(y.astype(jnp.bfloat16), w2_ref[lo:hi, :],
                                preferred_element_type=jnp.float32)
    else:
        # fori_loop bounds live ranges of the (TM, hidden_chunk) temporaries;
        # unroll=True keeps LLO scheduling visibility.
        def chunk_body(c, carry):
            lo = pl.multiple_of(c * hidden_chunk, hidden_chunk)
            y = jnp.dot(h_bf, w1_ref[:, pl.ds(lo, hidden_chunk)],
                        preferred_element_type=jnp.float32)
            y = y + b1_ref[:, pl.ds(lo, hidden_chunk)]
            y = _gelu(y)
            return carry + jnp.dot(y.astype(jnp.bfloat16),
                                   w2_ref[pl.ds(lo, hidden_chunk), :],
                                   preferred_element_type=jnp.float32)
        acc = lax.fori_loop(0, n_chunks, chunk_body, acc, unroll=True)

    h_out_ref[...] = (acc + b_fc2).astype(h_out_ref.dtype)


def block_forward(hidden_states, params, *, tile_rows=None, mlp_chunk=2048):
    """hidden_states: (B, L, D) float32. Returns (hidden_out, residual_out)."""
    B, L, D = hidden_states.shape
    N = B * L
    H = params["w1"].shape[1]

    x2d = hidden_states.reshape(N, D).astype(jnp.float32)

    # ---- generation-aware sizing --------------------------------------------
    vmem_cap = _vmem_capacity_bytes()
    vmem_budget = max(vmem_cap - 16 * 1024 * 1024, 8 * 1024 * 1024)  # headroom
    if tile_rows is None:
        # 128-MiB parts (v5e/v6e) get bigger row tiles; v7x (64 MiB) stays at 256.
        tile_rows = 512 if vmem_cap > 96 * 1024 * 1024 else 256

    # Row tile (MXU M-dim): multiple of 8, never larger than needed.
    tm = _round_up(min(tile_rows, _round_up(N, 8)), 8)
    grid_n = pl.cdiv(N, tm)
    # v7x has 2 TensorCores; the parallel row axis is the only way to use both.
    if grid_n == 1 and N >= 256:
        tm = _round_up(pl.cdiv(N, 2), 8)
        grid_n = pl.cdiv(N, tm)

    # MLP hidden chunk (multiple of 128 and divides H, else whole H).
    if mlp_chunk < H and H % mlp_chunk == 0 and mlp_chunk % 128 == 0:
        hidden_chunk = mlp_chunk
    else:
        hidden_chunk = H

    def vmem_need(tm_, hc_, weight_bufs):
        rows = 2 * 3 * tm_ * D * 4                       # dbl-buffered x + 2 outs
        weights = weight_bufs * 2 * (D * D + 2 * D * H)  # bf16 matmul weights
        small = weight_bufs * 4 * (7 * D + H)            # f32 LN params / biases
        temps = 4 * tm_ * (3 * D + 2 * hc_)              # f32 intermediates
        return rows + weights + small + temps

    # Shrink tm first, then the MLP chunk, until the working set fits.
    while vmem_need(tm, hidden_chunk, 1) > vmem_budget and tm > 64:
        tm = max(64, _round_up(tm // 2, 8))
    while (vmem_need(tm, hidden_chunk, 1) > vmem_budget and hidden_chunk > 512
           and hidden_chunk % 256 == 0 and H % (hidden_chunk // 2) == 0):
        hidden_chunk //= 2
    grid_n = pl.cdiv(N, tm)
    # TODO(synk): if the full bf16 fc1/fc2 weights alone exceed the VMEM budget
    # (huge D/H on v7x), the hidden-chunk loop should become a second
    # "arbitrary" grid axis so the chunk weights are pipelined instead of
    # resident; not needed at the dims exercised here.

    need = vmem_need(tm, hidden_chunk, 1)
    compiler_kwargs = dict(dimension_semantics=("parallel",))
    if need > 16 * 1024 * 1024:           # v5e default scoped limit is 16 MiB
        compiler_kwargs["vmem_limit_bytes"] = int(min(max(need, 16 * 1024 * 1024),
                                                      vmem_budget))

    # Weights are stored bf16 in params (no per-call cast); biases/LN stay f32.
    row_spec = pl.BlockSpec((tm, D), lambda i: (i, 0))

    def full_spec(shape, single_buffer):
        # Grid-invariant (weight-resident) input: constant index_map. With
        # single_buffer=True only one VMEM buffer is allocated instead of two.
        idx = lambda i: (0,) * len(shape)
        if single_buffer:
            return pl.BlockSpec(shape, idx, pipeline_mode=pl.Buffered(1))
        return pl.BlockSpec(shape, idx)

    param_shapes = [
        (1, D), (1, D),        # ln1 gamma, beta
        (D, D), (1, D),        # mixer W (bf16), b
        (1, D), (1, D),        # ln2 gamma, beta
        (D, H), (1, H),        # fc1 W (bf16), b
        (H, D), (1, D),        # fc2 W (bf16), b
    ]
    out_specs = (row_spec, row_spec)
    # No host-side padding: Pallas masks the partial trailing row tile
    # (rows are independent, so garbage rows in the last tile are discarded).
    out_shape = (jax.ShapeDtypeStruct((N, D), jnp.float32),
                 jax.ShapeDtypeStruct((N, D), jnp.float32))

    cost = pl.CostEstimate(
        flops=N * (2 * D * D + 4 * D * H),
        transcendentals=N * H,
        bytes_accessed=(3 * N * D * 4                    # x in + two f32 outputs
                        + 2 * (D * D + 2 * D * H)        # bf16 weights
                        + 4 * (7 * D + H)),              # biases / LN params
    )

    kernel = functools.partial(_block_kernel, hidden_chunk=hidden_chunk)

    def make_call(single_buffer):
        in_specs = [row_spec] + [full_spec(s, single_buffer) for s in param_shapes]
        return pl.pallas_call(
            kernel,
            grid=(grid_n,),
            in_specs=in_specs,
            out_specs=out_specs,
            out_shape=out_shape,
            cost_estimate=cost,
            compiler_params=pltpu.CompilerParams(**compiler_kwargs),
        )

    args = (x2d,
            params["ln1_g"], params["ln1_b"],
            params["w_mix"], params["b_mix"],
            params["ln2_g"], params["ln2_b"],
            params["w1"], params["b1"],
            params["w2"], params["b2"])

    try:
        h_out, res_out = make_call(single_buffer=True)(*args)
    except Exception:
        # TODO(synk): pipeline_mode=pl.Buffered(1) unsupported on this jax
        # build; fall back to default double-buffered resident weights.
        h_out, res_out = make_call(single_buffer=False)(*args)

    return h_out.reshape(B, L, D), res_out.reshape(B, L, D)


def init_params(key, dim, hidden):
    """Deterministic init matching the PyTorch module's parameter shapes.
    Linear weights are stored pre-transposed to (in, out) and already cast to
    bf16 (MXU operand dtype) so no per-call cast / extra HBM pass is needed."""
    ks = jax.random.split(key, 3)

    def linear(k, fan_in, fan_out):
        bound = 1.0 / jnp.sqrt(fan_in)
        kw, kb = jax.random.split(k)
        w = jax.random.uniform(kw, (fan_in, fan_out), jnp.float32, -bound, bound)
        b = jax.random.uniform(kb, (1, fan_out), jnp.float32, -bound, bound)
        return w.astype(jnp.bfloat16), b

    w_mix, b_mix = linear(ks[0], dim, dim)      # TODO(synk): stand-in for the external
                                                # mixer_cls (Mamba) as a Linear(dim, dim)
    w1, b1 = linear(ks[1], dim, hidden)         # Mlp.fc1
    w2, b2 = linear(ks[2], hidden, dim)         # Mlp.fc2
    return {
        "ln1_g": jnp.ones((1, dim), jnp.float32),
        "ln1_b": jnp.zeros((1, dim), jnp.float32),
        "ln2_g": jnp.ones((1, dim), jnp.float32),
        "ln2_b": jnp.zeros((1, dim), jnp.float32),
        "w_mix": w_mix, "b_mix": b_mix,
        "w1": w1, "b1": b1,
        "w2": w2, "b2": b2,
    }


def reference_forward(x, p):
    """Pure-JAX reference of the same fused math (bf16 MXU operands mirrored)."""
    def ln(v, g, b):
        m = jnp.mean(v, -1, keepdims=True)
        var = jnp.mean((v - m) ** 2, -1, keepdims=True)
        return (v - m) * jax.lax.rsqrt(var + LN_EPS) * g + b

    def mm(a, w, b):
        return jnp.dot(a.astype(jnp.bfloat16), w.astype(jnp.bfloat16),
                       preferred_element_type=jnp.float32) + b

    residual = x
    h = ln(residual, p["ln1_g"], p["ln1_b"])
    h = mm(h, p["w_mix"], p["b_mix"])
    residual = h + residual
    h = ln(residual, p["ln2_g"], p["ln2_b"])
    y = mm(h, p["w1"], p["b1"])
    c = 0.7978845608028654
    y = 0.5 * y * (1.0 + jnp.tanh(c * (y + 0.044715 * y ** 3)))
    y = mm(y, p["w2"], p["b2"])
    return y, residual


if __name__ == "__main__":
    # Small but lane-dense shapes: D multiple of 128 so stores are unmasked.
    B, L, D = 2, 8, 128
    H = 4 * D  # Mlp hidden_features = 4 * dim (module default)

    key = jax.random.PRNGKey(0)
    k_x, k_p = jax.random.split(key)
    x = jax.random.normal(k_x, (B, L, D), jnp.float32)
    params = init_params(k_p, D, H)

    h_out, res_out = jax.block_until_ready(block_forward(x, params))

    h_ref, res_ref = reference_forward(x, params)
    assert jnp.allclose(h_out, h_ref, atol=2e-2, rtol=2e-2), \
        float(jnp.max(jnp.abs(h_out - h_ref)))
    assert jnp.allclose(res_out, res_ref, atol=2e-2, rtol=2e-2), \
        float(jnp.max(jnp.abs(res_out - res_ref)))

    print("KERNEL_OK")
</pallas_src>

<mosaic_0001>
module attributes {stable_mosaic.version = 11 : i64} {
  func.func @_block_kernel(%arg0: i32, %arg1: memref<16x128xf32, #tpu.memory_space<vmem>>, %arg2: memref<1x128xf32, #tpu.memory_space<vmem>>, %arg3: memref<1x128xf32, #tpu.memory_space<vmem>>, %arg4: memref<128x128xbf16, #tpu.memory_space<vmem>>, %arg5: memref<1x128xf32, #tpu.memory_space<vmem>>, %arg6: memref<1x128xf32, #tpu.memory_space<vmem>>, %arg7: memref<1x128xf32, #tpu.memory_space<vmem>>, %arg8: memref<128x512xbf16, #tpu.memory_space<vmem>>, %arg9: memref<1x512xf32, #tpu.memory_space<vmem>>, %arg10: memref<512x128xbf16, #tpu.memory_space<vmem>>, %arg11: memref<1x128xf32, #tpu.memory_space<vmem>>, %arg12: memref<16x128xf32, #tpu.memory_space<vmem>>, %arg13: memref<16x128xf32, #tpu.memory_space<vmem>>) attributes {dimension_semantics = [#tpu.dimension_semantics<parallel>], iteration_bounds = array<i64: 1>, scalar_prefetch = 0 : i64, scratch_operands = 0 : i64, tpu.core_type = #tpu.core_type<tc>, window_params = [{transform_indices = @transform_0, window_bounds = array<i64: 16, 128>}, {pipeline_mode = #tpu.pipeline_mode<synchronous>, transform_indices = @transform_1, window_bounds = array<i64: 1, 128>}, {pipeline_mode = #tpu.pipeline_mode<synchronous>, transform_indices = @transform_2, window_bounds = array<i64: 1, 128>}, {pipeline_mode = #tpu.pipeline_mode<synchronous>, transform_indices = @transform_3, window_bounds = array<i64: 128, 128>}, {pipeline_mode = #tpu.pipeline_mode<synchronous>, transform_indices = @transform_4, window_bounds = array<i64: 1, 128>}, {pipeline_mode = #tpu.pipeline_mode<synchronous>, transform_indices = @transform_5, window_bounds = array<i64: 1, 128>}, {pipeline_mode = #tpu.pipeline_mode<synchronous>, transform_indices = @transform_6, window_bounds = array<i64: 1, 128>}, {pipeline_mode = #tpu.pipeline_mode<synchronous>, transform_indices = @transform_7, window_bounds = array<i64: 128, 512>}, {pipeline_mode = #tpu.pipeline_mode<synchronous>, transform_indices = @transform_8, window_bounds = array<i64: 1, 512>}, {pipeline_mode = #tpu.pipeline_mode<synchronous>, transform_indices = @transform_9, window_bounds = array<i64: 512, 128>}, {pipeline_mode = #tpu.pipeline_mode<synchronous>, transform_indices = @transform_10, window_bounds = array<i64: 1, 128>}, {transform_indices = @transform_11, window_bounds = array<i64: 16, 128>}, {transform_indices = @transform_12, window_bounds = array<i64: 16, 128>}]} {
    %c0 = arith.constant 0 : index
    %c0_0 = arith.constant 0 : index
    %0 = vector.load %arg1[%c0, %c0_0] : memref<16x128xf32, #tpu.memory_space<vmem>>, vector<16x128xf32>
    %c0_1 = arith.constant 0 : index
    %c0_2 = arith.constant 0 : index
    %1 = vector.load %arg2[%c0_1, %c0_2] : memref<1x128xf32, #tpu.memory_space<vmem>>, vector<1x128xf32>
    %c0_3 = arith.constant 0 : index
    %c0_4 = arith.constant 0 : index
    %2 = vector.load %arg3[%c0_3, %c0_4] : memref<1x128xf32, #tpu.memory_space<vmem>>, vector<1x128xf32>
    %c0_5 = arith.constant 0 : index
    %c0_6 = arith.constant 0 : index
    %3 = vector.load %arg6[%c0_5, %c0_6] : memref<1x128xf32, #tpu.memory_space<vmem>>, vector<1x128xf32>
    %c0_7 = arith.constant 0 : index
    %c0_8 = arith.constant 0 : index
    %4 = vector.load %arg7[%c0_7, %c0_8] : memref<1x128xf32, #tpu.memory_space<vmem>>, vector<1x128xf32>
    %c0_9 = arith.constant 0 : index
    %c0_10 = arith.constant 0 : index
    %5 = vector.load %arg5[%c0_9, %c0_10] : memref<1x128xf32, #tpu.memory_space<vmem>>, vector<1x128xf32>
    %c0_11 = arith.constant 0 : index
    %c0_12 = arith.constant 0 : index
    %6 = vector.load %arg11[%c0_11, %c0_12] : memref<1x128xf32, #tpu.memory_space<vmem>>, vector<1x128xf32>
    %cst = arith.constant dense<0.000000e+00> : vector<16xf32>
    %7 = vector.multi_reduction <add>, %0, %cst [1] : vector<16x128xf32> to vector<16xf32>
    %8 = vector.shape_cast %7 : vector<16xf32> to vector<16x1xf32>
    %cst_13 = arith.constant 1.280000e+02 : f32
    %9 = vector.broadcast %cst_13 : f32 to vector<16x1xf32>
    %10 = arith.divf %8, %9 : vector<16x1xf32>
    %11 = vector.broadcast %10 : vector<16x1xf32> to vector<16x128xf32>
    %12 = arith.subf %0, %11 : vector<16x128xf32>
    %13 = arith.mulf %12, %12 : vector<16x128xf32>
    %cst_14 = arith.constant dense<0.000000e+00> : vector<16xf32>
    %14 = vector.multi_reduction <add>, %13, %cst_14 [1] : vector<16x128xf32> to vector<16xf32>
    %15 = vector.shape_cast %14 : vector<16xf32> to vector<16x1xf32>
    %cst_15 = arith.constant 1.280000e+02 : f32
    %16 = vector.broadcast %cst_15 : f32 to vector<16x1xf32>
    %17 = arith.divf %15, %16 : vector<16x1xf32>
    %cst_16 = arith.constant 9.99999974E-6 : f32
    %18 = vector.broadcast %cst_16 : f32 to vector<16x1xf32>
    %19 = arith.addf %17, %18 : vector<16x1xf32>
    %20 = math.rsqrt %19 : vector<16x1xf32>
    %21 = vector.broadcast %20 : vector<16x1xf32> to vector<16x128xf32>
    %22 = arith.mulf %12, %21 : vector<16x128xf32>
    %23 = vector.broadcast %1 : vector<1x128xf32> to vector<16x128xf32>
    %24 = arith.mulf %22, %23 : vector<16x128xf32>
    %25 = vector.broadcast %2 : vector<1x128xf32> to vector<16x128xf32>
    %26 = arith.addf %24, %25 : vector<16x128xf32>
    %27 = arith.truncf %26 : vector<16x128xf32> to vector<16x128xbf16>
    %c0_17 = arith.constant 0 : index
    %c0_18 = arith.constant 0 : index
    %28 = vector.load %arg4[%c0_17, %c0_18] : memref<128x128xbf16, #tpu.memory_space<vmem>>, vector<128x128xbf16>
    %cst_19 = arith.constant dense<0.000000e+00> : vector<16x128xf32>
    %29 = tpu.matmul %27, %28, %cst_19 {dimension_numbers = #tpu.dot_dimension_numbers<[1], [0], [0], [1], [0, 0, 1, 1], [], []>} : vector<16x128xbf16>, vector<128x128xbf16>, vector<16x128xf32> -> vector<16x128xf32>
    %30 = vector.broadcast %5 : vector<1x128xf32> to vector<16x128xf32>
    %31 = arith.addf %29, %30 : vector<16x128xf32>
    %32 = arith.addf %31, %0 : vector<16x128xf32>
    %c0_20 = arith.constant 0 : index
    %c0_21 = arith.constant 0 : index
    %33 = vector.load %arg13[%c0_20, %c0_21] : memref<16x128xf32, #tpu.memory_space<vmem>>, vector<16x128xf32>
    tpu.vector_store %arg13[%c0_20, %c0_21], %32 {strides = array<i32>} : memref<16x128xf32, #tpu.memory_space<vmem>>, vector<16x128xf32>,
    %cst_22 = arith.constant dense<0.000000e+00> : vector<16xf32>
    %34 = vector.multi_reduction <add>, %32, %cst_22 [1] : vector<16x128xf32> to vector<16xf32>
    %35 = vector.shape_cast %34 : vector<16xf32> to vector<16x1xf32>
    %cst_23 = arith.constant 1.280000e+02 : f32
    %36 = vector.broadcast %cst_23 : f32 to vector<16x1xf32>
    %37 = arith.divf %35, %36 : vector<16x1xf32>
    %38 = vector.broadcast %37 : vector<16x1xf32> to vector<16x128xf32>
    %39 = arith.subf %32, %38 : vector<16x128xf32>
    %40 = arith.mulf %39, %39 : vector<16x128xf32>
    %cst_24 = arith.constant dense<0.000000e+00> : vector<16xf32>
    %41 = vector.multi_reduction <add>, %40, %cst_24 [1] : vector<16x128xf32> to vector<16xf32>
    %42 = vector.shape_cast %41 : vector<16xf32> to vector<16x1xf32>
    %cst_25 = arith.constant 1.280000e+02 : f32
    %43 = vector.broadcast %cst_25 : f32 to vector<16x1xf32>
    %44 = arith.divf %42, %43 : vector<16x1xf32>
    %cst_26 = arith.constant 9.99999974E-6 : f32
    %45 = vector.broadcast %cst_26 : f32 to vector<16x1xf32>
    %46 = arith.addf %44, %45 : vector<16x1xf32>
    %47 = math.rsqrt %46 : vector<16x1xf32>
    %48 = vector.broadcast %47 : vector<16x1xf32> to vector<16x128xf32>
    %49 = arith.mulf %39, %48 : vector<16x128xf32>
    %50 = vector.broadcast %3 : vector<1x128xf32> to vector<16x128xf32>
    %51 = arith.mulf %49, %50 : vector<16x128xf32>
    %52 = vector.broadcast %4 : vector<1x128xf32> to vector<16x128xf32>
    %53 = arith.addf %51, %52 : vector<16x128xf32>
    %54 = arith.truncf %53 : vector<16x128xf32> to vector<16x128xbf16>
    %cst_27 = arith.constant 0.000000e+00 : f32
    %55 = vector.broadcast %cst_27 : f32 to vector<16x128xf32>
    %c0_28 = arith.constant 0 : index
    %c0_29 = arith.constant 0 : index
    %56 = vector.load %arg8[%c0_28, %c0_29] : memref<128x512xbf16, #tpu.memory_space<vmem>>, vector<128x512xbf16>
    %cst_30 = arith.constant dense<0.000000e+00> : vector<16x512xf32>
    %57 = tpu.matmul %54, %56, %cst_30 {dimension_numbers = #tpu.dot_dimension_numbers<[1], [0], [0], [1], [0, 0, 1, 1], [], []>} : vector<16x128xbf16>, vector<128x512xbf16>, vector<16x512xf32> -> vector<16x512xf32>
    %c0_31 = arith.constant 0 : index
    %c0_32 = arith.constant 0 : index
    %58 = vector.load %arg9[%c0_31, %c0_32] : memref<1x512xf32, #tpu.memory_space<vmem>>, vector<1x512xf32>
    %59 = vector.broadcast %58 : vector<1x512xf32> to vector<16x512xf32>
    %60 = arith.addf %57, %59 : vector<16x512xf32>
    %cst_33 = arith.constant 5.000000e-01 : f32
    %61 = vector.broadcast %cst_33 : f32 to vector<16x512xf32>
    %62 = arith.mulf %61, %60 : vector<16x512xf32>
    %cst_34 = arith.constant 4.471500e-02 : f32
    %63 = vector.broadcast %cst_34 : f32 to vector<16x512xf32>
    %64 = arith.mulf %63, %60 : vector<16x512xf32>
    %65 = arith.mulf %64, %60 : vector<16x512xf32>
    %66 = arith.mulf %65, %60 : vector<16x512xf32>
    %67 = arith.addf %60, %66 : vector<16x512xf32>
    %cst_35 = arith.constant 0.797884583 : f32
    %68 = vector.broadcast %cst_35 : f32 to vector<16x512xf32>
    %69 = arith.mulf %68, %67 : vector<16x512xf32>
    %70 = math.tanh %69 : vector<16x512xf32>
    %cst_36 = arith.constant 1.000000e+00 : f32
    %71 = vector.broadcast %cst_36 : f32 to vector<16x512xf32>
    %72 = arith.addf %71, %70 : vector<16x512xf32>
    %73 = arith.mulf %62, %72 : vector<16x512xf32>
    %74 = arith.truncf %73 : vector<16x512xf32> to vector<16x512xbf16>
    %c0_37 = arith.constant 0 : index
    %c0_38 = arith.constant 0 : index
    %75 = vector.load %arg10[%c0_37, %c0_38] : memref<512x128xbf16, #tpu.memory_space<vmem>>, vector<512x128xbf16>
    %cst_39 = arith.constant dense<0.000000e+00> : vector<16x128xf32>
    %76 = tpu.matmul %74, %75, %cst_39 {dimension_numbers = #tpu.dot_dimension_numbers<[1], [0], [0], [1], [0, 0, 1, 1], [], []>} : vector<16x512xbf16>, vector<512x128xbf16>, vector<16x128xf32> -> vector<16x128xf32>
    %77 = arith.addf %55, %76 : vector<16x128xf32>
    %78 = vector.broadcast %6 : vector<1x128xf32> to vector<16x128xf32>
    %79 = arith.addf %77, %78 : vector<16x128xf32>
    %c0_40 = arith.constant 0 : index
    %c0_41 = arith.constant 0 : index
    %80 = vector.load %arg12[%c0_40, %c0_41] : memref<16x128xf32, #tpu.memory_space<vmem>>, vector<16x128xf32>
    tpu.vector_store %arg12[%c0_40, %c0_41], %79 {strides = array<i32>} : memref<16x128xf32, #tpu.memory_space<vmem>>, vector<16x128xf32>,
    return
  }
  func.func @transform_0(%arg0: i32) -> (i32, i32) {
    %c0_i32 = arith.constant 0 : i32
    %c0_i32_0 = arith.constant 0 : i32
    return %arg0, %c0_i32 : i32, i32
  }
  func.func @transform_1(%arg0: i32) -> (i32, i32) {
    %c0_i32 = arith.constant 0 : i32
    %c0_i32_0 = arith.constant 0 : i32
    %c0_i32_1 = arith.constant 0 : i32
    return %c0_i32, %c0_i32_0 : i32, i32
  }
  func.func @transform_2(%arg0: i32) -> (i32, i32) {
    %c0_i32 = arith.constant 0 : i32
    %c0_i32_0 = arith.constant 0 : i32
    %c0_i32_1 = arith.constant 0 : i32
    return %c0_i32, %c0_i32_0 : i32, i32
  }
  func.func @transform_3(%arg0: i32) -> (i32, i32) {
    %c0_i32 = arith.constant 0 : i32
    %c0_i32_0 = arith.constant 0 : i32
    %c0_i32_1 = arith.constant 0 : i32
    return %c0_i32, %c0_i32_0 : i32, i32
  }
  func.func @transform_4(%arg0: i32) -> (i32, i32) {
    %c0_i32 = arith.constant 0 : i32
    %c0_i32_0 = arith.constant 0 : i32
    %c0_i32_1 = arith.constant 0 : i32
    return %c0_i32, %c0_i32_0 : i32, i32
  }
  func.func @transform_5(%arg0: i32) -> (i32, i32) {
    %c0_i32 = arith.constant 0 : i32
    %c0_i32_0 = arith.constant 0 : i32
    %c0_i32_1 = arith.constant 0 : i32
    return %c0_i32, %c0_i32_0 : i32, i32
  }
  func.func @transform_6(%arg0: i32) -> (i32, i32) {
    %c0_i32 = arith.constant 0 : i32
    %c0_i32_0 = arith.constant 0 : i32
    %c0_i32_1 = arith.constant 0 : i32
    return %c0_i32, %c0_i32_0 : i32, i32
  }
  func.func @transform_7(%arg0: i32) -> (i32, i32) {
    %c0_i32 = arith.constant 0 : i32
    %c0_i32_0 = arith.constant 0 : i32
    %c0_i32_1 = arith.constant 0 : i32
    return %c0_i32, %c0_i32_0 : i32, i32
  }
  func.func @transform_8(%arg0: i32) -> (i32, i32) {
    %c0_i32 = arith.constant 0 : i32
    %c0_i32_0 = arith.constant 0 : i32
    %c0_i32_1 = arith.constant 0 : i32
    return %c0_i32, %c0_i32_0 : i32, i32
  }
  func.func @transform_9(%arg0: i32) -> (i32, i32) {
    %c0_i32 = arith.constant 0 : i32
    %c0_i32_0 = arith.constant 0 : i32
    %c0_i32_1 = arith.constant 0 : i32
    return %c0_i32, %c0_i32_0 : i32, i32
  }
  func.func @transform_10(%arg0: i32) -> (i32, i32) {
    %c0_i32 = arith.constant 0 : i32
    %c0_i32_0 = arith.constant 0 : i32
    %c0_i32_1 = arith.constant 0 : i32
    return %c0_i32, %c0_i32_0 : i32, i32
  }
  func.func @transform_11(%arg0: i32) -> (i32, i32) {
    %c0_i32 = arith.constant 0 : i32
    %c0_i32_0 = arith.constant 0 : i32
    return %arg0, %c0_i32 : i32, i32
  }
  func.func @transform_12(%arg0: i32) -> (i32, i32) {
    %c0_i32 = arith.constant 0 : i32
    %c0_i32_0 = arith.constant 0 : i32
    return %arg0, %c0_i32 : i32, i32
  }
}

module attributes {stable_mosaic.version = 11 : i64} {
  func.func @_block_kernel(%arg0: i32, %arg1: memref<16x128xf32, #tpu.memory_space<vmem>>, %arg2: memref<1x128xf32, #tpu.memory_space<vmem>>, %arg3: memref<1x128xf32, #tpu.memory_space<vmem>>, %arg4: memref<128x128xbf16, #tpu.memory_space<vmem>>, %arg5: memref<1x128xf32, #tpu.memory_space<vmem>>, %arg6: memref<1x128xf32, #tpu.memory_space<vmem>>, %arg7: memref<1x128xf32, #tpu.memory_space<vmem>>, %arg8: memref<128x512xbf16, #tpu.memory_space<vmem>>, %arg9: memref<1x512xf32, #tpu.memory_space<vmem>>, %arg10: memref<512x128xbf16, #tpu.memory_space<vmem>>, %arg11: memref<1x128xf32, #tpu.memory_space<vmem>>, %arg12: memref<16x128xf32, #tpu.memory_space<vmem>>, %arg13: memref<16x128xf32, #tpu.memory_space<vmem>>) attributes {dimension_semantics = [#tpu.dimension_semantics<parallel>], iteration_bounds = array<i64: 1>, scalar_prefetch = 0 : i64, scratch_operands = 0 : i64, tpu.core_type = #tpu.core_type<tc>, window_params = [{transform_indices = @transform_0, window_bounds = array<i64: 16, 128>}, {pipeline_mode = #tpu.pipeline_mode<synchronous>, transform_indices = @transform_1, window_bounds = array<i64: 1, 128>}, {pipeline_mode = #tpu.pipeline_mode<synchronous>, transform_indices = @transform_2, window_bounds = array<i64: 1, 128>}, {pipeline_mode = #tpu.pipeline_mode<synchronous>, transform_indices = @transform_3, window_bounds = array<i64: 128, 128>}, {pipeline_mode = #tpu.pipeline_mode<synchronous>, transform_indices = @transform_4, window_bounds = array<i64: 1, 128>}, {pipeline_mode = #tpu.pipeline_mode<synchronous>, transform_indices = @transform_5, window_bounds = array<i64: 1, 128>}, {pipeline_mode = #tpu.pipeline_mode<synchronous>, transform_indices = @transform_6, window_bounds = array<i64: 1, 128>}, {pipeline_mode = #tpu.pipeline_mode<synchronous>, transform_indices = @transform_7, window_bounds = array<i64: 128, 512>}, {pipeline_mode = #tpu.pipeline_mode<synchronous>, transform_indices = @transform_8, window_bounds = array<i64: 1, 512>}, {pipeline_mode = #tpu.pipeline_mode<synchronous>, transform_indices = @transform_9, window_bounds = array<i64: 512, 128>}, {pipeline_mode = #tpu.pipeline_mode<synchronous>, transform_indices = @transform_10, window_bounds = array<i64: 1, 128>}, {transform_indices = @transform_11, window_bounds = array<i64: 16, 128>}, {transform_indices = @transform_12, window_bounds = array<i64: 16, 128>}]} {
    %c0 = arith.constant 0 : index
    %c0_0 = arith.constant 0 : index
    %0 = vector.load %arg1[%c0, %c0_0] : memref<16x128xf32, #tpu.memory_space<vmem>>, vector<16x128xf32>
    %c0_1 = arith.constant 0 : index
    %c0_2 = arith.constant 0 : index
    %1 = vector.load %arg2[%c0_1, %c0_2] : memref<1x128xf32, #tpu.memory_space<vmem>>, vector<1x128xf32>
    %c0_3 = arith.constant 0 : index
    %c0_4 = arith.constant 0 : index
    %2 = vector.load %arg3[%c0_3, %c0_4] : memref<1x128xf32, #tpu.memory_space<vmem>>, vector<1x128xf32>
    %c0_5 = arith.constant 0 : index
    %c0_6 = arith.constant 0 : index
    %3 = vector.load %arg6[%c0_5, %c0_6] : memref<1x128xf32, #tpu.memory_space<vmem>>, vector<1x128xf32>
    %c0_7 = arith.constant 0 : index
    %c0_8 = arith.constant 0 : index
    %4 = vector.load %arg7[%c0_7, %c0_8] : memref<1x128xf32, #tpu.memory_space<vmem>>, vector<1x128xf32>
    %c0_9 = arith.constant 0 : index
    %c0_10 = arith.constant 0 : index
    %5 = vector.load %arg5[%c0_9, %c0_10] : memref<1x128xf32, #tpu.memory_space<vmem>>, vector<1x128xf32>
    %c0_11 = arith.constant 0 : index
    %c0_12 = arith.constant 0 : index
    %6 = vector.load %arg11[%c0_11, %c0_12] : memref<1x128xf32, #tpu.memory_space<vmem>>, vector<1x128xf32>
    %cst = arith.constant dense<0.000000e+00> : vector<16xf32>
    %7 = vector.multi_reduction <add>, %0, %cst [1] : vector<16x128xf32> to vector<16xf32>
    %8 = vector.shape_cast %7 : vector<16xf32> to vector<16x1xf32>
    %cst_13 = arith.constant 1.280000e+02 : f32
    %9 = vector.broadcast %cst_13 : f32 to vector<16x1xf32>
    %10 = arith.divf %8, %9 : vector<16x1xf32>
    %11 = vector.broadcast %10 : vector<16x1xf32> to vector<16x128xf32>
    %12 = arith.subf %0, %11 : vector<16x128xf32>
    %13 = arith.mulf %12, %12 : vector<16x128xf32>
    %cst_14 = arith.constant dense<0.000000e+00> : vector<16xf32>
    %14 = vector.multi_reduction <add>, %13, %cst_14 [1] : vector<16x128xf32> to vector<16xf32>
    %15 = vector.shape_cast %14 : vector<16xf32> to vector<16x1xf32>
    %cst_15 = arith.constant 1.280000e+02 : f32
    %16 = vector.broadcast %cst_15 : f32 to vector<16x1xf32>
    %17 = arith.divf %15, %16 : vector<16x1xf32>
    %cst_16 = arith.constant 9.99999974E-6 : f32
    %18 = vector.broadcast %cst_16 : f32 to vector<16x1xf32>
    %19 = arith.addf %17, %18 : vector<16x1xf32>
    %20 = math.rsqrt %19 : vector<16x1xf32>
    %21 = vector.broadcast %20 : vector<16x1xf32> to vector<16x128xf32>
    %22 = arith.mulf %12, %21 : vector<16x128xf32>
    %23 = vector.broadcast %1 : vector<1x128xf32> to vector<16x128xf32>
    %24 = arith.mulf %22, %23 : vector<16x128xf32>
    %25 = vector.broadcast %2 : vector<1x128xf32> to vector<16x128xf32>
    %26 = arith.addf %24, %25 : vector<16x128xf32>
    %27 = arith.truncf %26 : vector<16x128xf32> to vector<16x128xbf16>
    %c0_17 = arith.constant 0 : index
    %c0_18 = arith.constant 0 : index
    %28 = vector.load %arg4[%c0_17, %c0_18] : memref<128x128xbf16, #tpu.memory_space<vmem>>, vector<128x128xbf16>
    %cst_19 = arith.constant dense<0.000000e+00> : vector<16x128xf32>
    %29 = tpu.matmul %27, %28, %cst_19 {dimension_numbers = #tpu.dot_dimension_numbers<[1], [0], [0], [1], [0, 0, 1, 1], [], []>} : vector<16x128xbf16>, vector<128x128xbf16>, vector<16x128xf32> -> vector<16x128xf32>
    %30 = vector.broadcast %5 : vector<1x128xf32> to vector<16x128xf32>
    %31 = arith.addf %29, %30 : vector<16x128xf32>
    %32 = arith.addf %31, %0 : vector<16x128xf32>
    %c0_20 = arith.constant 0 : index
    %c0_21 = arith.constant 0 : index
    %33 = vector.load %arg13[%c0_20, %c0_21] : memref<16x128xf32, #tpu.memory_space<vmem>>, vector<16x128xf32>
    tpu.vector_store %arg13[%c0_20, %c0_21], %32 {strides = array<i32>} : memref<16x128xf32, #tpu.memory_space<vmem>>, vector<16x128xf32>,
    %cst_22 = arith.constant dense<0.000000e+00> : vector<16xf32>
    %34 = vector.multi_reduction <add>, %32, %cst_22 [1] : vector<16x128xf32> to vector<16xf32>
    %35 = vector.shape_cast %34 : vector<16xf32> to vector<16x1xf32>
    %cst_23 = arith.constant 1.280000e+02 : f32
    %36 = vector.broadcast %cst_23 : f32 to vector<16x1xf32>
    %37 = arith.divf %35, %36 : vector<16x1xf32>
    %38 = vector.broadcast %37 : vector<16x1xf32> to vector<16x128xf32>
    %39 = arith.subf %32, %38 : vector<16x128xf32>
    %40 = arith.mulf %39, %39 : vector<16x128xf32>
    %cst_24 = arith.constant dense<0.000000e+00> : vector<16xf32>
    %41 = vector.multi_reduction <add>, %40, %cst_24 [1] : vector<16x128xf32> to vector<16xf32>
    %42 = vector.shape_cast %41 : vector<16xf32> to vector<16x1xf32>
    %cst_25 = arith.constant 1.280000e+02 : f32
    %43 = vector.broadcast %cst_25 : f32 to vector<16x1xf32>
    %44 = arith.divf %42, %43 : vector<16x1xf32>
    %cst_26 = arith.constant 9.99999974E-6 : f32
    %45 = vector.broadcast %cst_26 : f32 to vector<16x1xf32>
    %46 = arith.addf %44, %45 : vector<16x1xf32>
    %47 = math.rsqrt %46 : vector<16x1xf32>
    %48 = vector.broadcast %47 : vector<16x1xf32> to vector<16x128xf32>
    %49 = arith.mulf %39, %48 : vector<16x128xf32>
    %50 = vector.broadcast %3 : vector<1x128xf32> to vector<16x128xf32>
    %51 = arith.mulf %49, %50 : vector<16x128xf32>
    %52 = vector.broadcast %4 : vector<1x128xf32> to vector<16x128xf32>
    %53 = arith.addf %51, %52 : vector<16x128xf32>
    %54 = arith.truncf %53 : vector<16x128xf32> to vector<16x128xbf16>
    %cst_27 = arith.constant 0.000000e+00 : f32
    %55 = vector.broadcast %cst_27 : f32 to vector<16x128xf32>
    %c0_28 = arith.constant 0 : index
    %c0_29 = arith.constant 0 : index
    %56 = vector.load %arg8[%c0_28, %c0_29] : memref<128x512xbf16, #tpu.memory_space<vmem>>, vector<128x512xbf16>
    %cst_30 = arith.constant dense<0.000000e+00> : vector<16x512xf32>
    %57 = tpu.matmul %54, %56, %cst_30 {dimension_numbers = #tpu.dot_dimension_numbers<[1], [0], [0], [1], [0, 0, 1, 1], [], []>} : vector<16x128xbf16>, vector<128x512xbf16>, vector<16x512xf32> -> vector<16x512xf32>
    %c0_31 = arith.constant 0 : index
    %c0_32 = arith.constant 0 : index
    %58 = vector.load %arg9[%c0_31, %c0_32] : memref<1x512xf32, #tpu.memory_space<vmem>>, vector<1x512xf32>
    %59 = vector.broadcast %58 : vector<1x512xf32> to vector<16x512xf32>
    %60 = arith.addf %57, %59 : vector<16x512xf32>
    %cst_33 = arith.constant 5.000000e-01 : f32
    %61 = vector.broadcast %cst_33 : f32 to vector<16x512xf32>
    %62 = arith.mulf %61, %60 : vector<16x512xf32>
    %cst_34 = arith.constant 4.471500e-02 : f32
    %63 = vector.broadcast %cst_34 : f32 to vector<16x512xf32>
    %64 = arith.mulf %63, %60 : vector<16x512xf32>
    %65 = arith.mulf %64, %60 : vector<16x512xf32>
    %66 = arith.mulf %65, %60 : vector<16x512xf32>
    %67 = arith.addf %60, %66 : vector<16x512xf32>
    %cst_35 = arith.constant 0.797884583 : f32
    %68 = vector.broadcast %cst_35 : f32 to vector<16x512xf32>
    %69 = arith.mulf %68, %67 : vector<16x512xf32>
    %70 = math.tanh %69 : vector<16x512xf32>
    %cst_36 = arith.constant 1.000000e+00 : f32
    %71 = vector.broadcast %cst_36 : f32 to vector<16x512xf32>
    %72 = arith.addf %71, %70 : vector<16x512xf32>
    %73 = arith.mulf %62, %72 : vector<16x512xf32>
    %74 = arith.truncf %73 : vector<16x512xf32> to vector<16x512xbf16>
    %c0_37 = arith.constant 0 : index
    %c0_38 = arith.constant 0 : index
    %75 = vector.load %arg10[%c0_37, %c0_38] : memref<512x128xbf16, #tpu.memory_space<vmem>>, vector<512x128xbf16>
    %cst_39 = arith.constant dense<0.000000e+00> : vector<16x128xf32>
    %76 = tpu.matmul %74, %75, %cst_39 {dimension_numbers = #tpu.dot_dimension_numbers<[1], [0], [0], [1], [0, 0, 1, 1], [], []>} : vector<16x512xbf16>, vector<512x128xbf16>, vector<16x128xf32> -> vector<16x128xf32>
    %77 = arith.addf %55, %76 : vector<16x128xf32>
    %78 = vector.broadcast %6 : vector<1x128xf32> to vector<16x128xf32>
    %79 = arith.addf %77, %78 : vector<16x128xf32>
    %c0_40 = arith.constant 0 : index
    %c0_41 = arith.constant 0 : index
    %80 = vector.load %arg12[%c0_40, %c0_41] : memref<16x128xf32, #tpu.memory_space<vmem>>, vector<16x128xf32>
    tpu.vector_store %arg12[%c0_40, %c0_41], %79 {strides = array<i32>} : memref<16x128xf32, #tpu.memory_space<vmem>>, vector<16x128xf32>,
    return
  }
  func.func @transform_0(%arg0: i32) -> (i32, i32) {
    %c0_i32 = arith.constant 0 : i32
    %c0_i32_0 = arith.constant 0 : i32
    return %arg0, %c0_i32 : i32, i32
  }
  func.func @transform_1(%arg0: i32) -> (i32, i32) {
    %c0_i32 = arith.constant 0 : i32
    %c0_i32_0 = arith.constant 0 : i32
    %c0_i32_1 = arith.constant 0 : i32
    return %c0_i32, %c0_i32_0 : i32, i32
  }
  func.func @transform_2(%arg0: i32) -> (i32, i32) {
    %c0_i32 = arith.constant 0 : i32
    %c0_i32_0 = arith.constant 0 : i32
    %c0_i32_1 = arith.constant 0 : i32
    return %c0_i32, %c0_i32_0 : i32, i32
  }
  func.func @transform_3(%arg0: i32) -> (i32, i32) {
    %c0_i32 = arith.constant 0 : i32
    %c0_i32_0 = arith.constant 0 : i32
    %c0_i32_1 = arith.constant 0 : i32
    return %c0_i32, %c0_i32_0 : i32, i32
  }
  func.func @transform_4(%arg0: i32) -> (i32, i32) {
    %c0_i32 = arith.constant 0 : i32
    %c0_i32_0 = arith.constant 0 : i32
    %c0_i32_1 = arith.constant 0 : i32
    return %c0_i32, %c0_i32_0 : i32, i32
  }
  func.func @transform_5(%arg0: i32) -> (i32, i32) {
    %c0_i32 = arith.constant 0 : i32
    %c0_i32_0 = arith.constant 0 : i32
    %c0_i32_1 = arith.constant 0 : i32
    return %c0_i32, %c0_i32_0 : i32, i32
  }
  func.func @transform_6(%arg0: i32) -> (i32, i32) {
    %c0_i32 = arith.constant 0 : i32
    %c0_i32_0 = arith.constant 0 : i32
    %c0_i32_1 = arith.constant 0 : i32
    return %c0_i32, %c0_i32_0 : i32, i32
  }
  func.func @transform_7(%arg0: i32) -> (i32, i32) {
    %c0_i32 = arith.constant 0 : i32
    %c0_i32_0 = arith.constant 0 : i32
    %c0_i32_1 = arith.constant 0 : i32
    return %c0_i32, %c0_i32_0 : i32, i32
  }
  func.func @transform_8(%arg0: i32) -> (i32, i32) {
    %c0_i32 = arith.constant 0 : i32
    %c0_i32_0 = arith.constant 0 : i32
    %c0_i32_1 = arith.constant 0 : i32
    return %c0_i32, %c0_i32_0 : i32, i32
  }
  func.func @transform_9(%arg0: i32) -> (i32, i32) {
    %c0_i32 = arith.constant 0 : i32
    %c0_i32_0 = arith.constant 0 : i32
    %c0_i32_1 = arith.constant 0 : i32
    return %c0_i32, %c0_i32_0 : i32, i32
  }
  func.func @transform_10(%arg0: i32) -> (i32, i32) {
    %c0_i32 = arith.constant 0 : i32
    %c0_i32_0 = arith.constant 0 : i32
    %c0_i32_1 = arith.constant 0 : i32
    return %c0_i32, %c0_i32_0 : i32, i32
  }
  func.func @transform_11(%arg0: i32) -> (i32, i32) {
    %c0_i32 = arith.constant 0 : i32
    %c0_i32_0 = arith.constant 0 : i32
    return %arg0, %c0_i32 : i32, i32
  }
  func.func @transform_12(%arg0: i32) -> (i32, i32) {
    %c0_i32 = arith.constant 0 : i32
    %c0_i32_0 = arith.constant 0 : i32
    return %arg0, %c0_i32 : i32, i32
  }
}

</mosaic_0001>

<bundles_post_ra>
// kernel: tpu_custom_call.1
= control target key start
LH: loop header
LB: loop body
LE: loop exit
PB: predicated region body
PF: predicated region fallthrough
CT: control target
= control target key end

     0   :  { %18 = vsyncpa [#allocation3], 0  ;;  %s1647_s0 = inlined_call_operand.hbm [shape: f32[16,128], index: 0, kind: input, shape index: {}]   ;;  %s1648_s1 = inlined_call_operand.vmem [shape: f32[1,128], index: 1, kind: input, shape index: {}]   ;;  %s1649_s2 = inlined_call_operand.vmem [shape: f32[1,128], index: 2, kind: input, shape index: {}]   ;;  %s1650_s3 = inlined_call_operand.hbm [shape: bf16[128,128], index: 3, kind: input, shape index: {}]   ;;  %s1651_s4 = inlined_call_operand.vmem [shape: f32[1,128], index: 4, kind: input, shape index: {}]   ;;  %s1652_s5 = inlined_call_operand.vmem [shape: f32[1,128], index: 5, kind: input, shape index: {}]   ;;  %s1653_s6 = inlined_call_operand.vmem [shape: f32[1,128], index: 6, kind: input, shape index: {}]   ;;  %s1654_s7 = inlined_call_operand.hbm [shape: bf16[128,512], index: 7, kind: input, shape index: {}]   ;;  %s1655_s8 = inlined_call_operand.vmem [shape: f32[1,512], index: 8, kind: input, shape index: {}]   ;;  %s1656_s9 = inlined_call_operand.hbm [shape: bf16[512,128], index: 9, kind: input, shape index: {}]   ;;  %s1657_s10 = inlined_call_operand.vmem [shape: f32[1,128], index: 10, kind: input, shape index: {}]   ;;  %s1658_s11 = inlined_call_operand.hbm [shape: f32[16,128], index: 11, kind: output, shape index: {0}]   ;;  %s1659_s12 = inlined_call_operand.hbm [shape: f32[16,128], index: 12, kind: output, shape index: {1}]  }
   0x1   :  { %19 = vsyncpa [#allocation6], 0 }
   0x2   :  { %20 = vsyncpa [#allocation9], 0 }
   0x3   :  { %21 = vsyncpa [#allocation4], 0 }
   0x4   :  { %22 = vsyncpa [#allocation12], 0  ;;  %s1465_s21 = smov [#allocation5]  }
   0x5   :  { %s44_s22 = sshll.u32 %s1465_s21, 4  ;;  %s45_s22 = int_to_ptr.vmem [resolvable:$true] %s44_s22 }
   0x6   :  { %s1343_s23 = scalar_lea.vmem %s45_s22, 1024  ;;  %p1348_p1 = scmp.lt.s32.totalorder %s45_s22, %s45_s22 }
   0x7   :  { %p1344_p0 = scmp.ne.s32.totalorder %s45_s22, %s1343_s23  ;;  %p1349_p2 = scmp.lt.s32.totalorder %s1343_s23, %s1343_s23 }
   0x9   :  { %p1350_p3 = por %p1349_p2, %p1348_p1 }
   0xb   :  { %p1351_p4 = pnand %p1350_p3, %p1344_p0 }
   0xd   :  { %1354 = shalt.err (!%p1351_p4)
}
   0xe   :  { %s1466_s24 = smov 64   ;;  %s1467_s25 = smov 4  }
   0xf   :  { %50 = dma.hbm_to_vmem [thread:$0]  %s1650_s3, 1024, %s45_s22, [#allocation6], %s1466_s24, %s1466_s24, %s1467_s25  }
  0x10   :  { %s1468_s28 = smov [#allocation2]  }
  0x11   :  { %s28_s29 = sshll.u32 %s1468_s28, 4  ;;  %s29_s29 = int_to_ptr.vmem [resolvable:$true] %s28_s29 }
  0x12   :  { %s1363_s30 = scalar_lea.vmem %s29_s29, 256  ;;  %p1368_p6 = scmp.lt.s32.totalorder %s29_s29, %s29_s29 }
  0x13   :  { %p1364_p5 = scmp.ne.s32.totalorder %s29_s29, %s1363_s30  ;;  %p1369_p7 = scmp.lt.s32.totalorder %s1363_s30, %s1363_s30 }
  0x15   :  { %p1370_p8 = por %p1369_p7, %p1368_p6 }
  0x17   :  { %p1371_p9 = pnand %p1370_p8, %p1364_p5 }
  0x19   :  { %1374 = shalt.err (!%p1371_p9)
}
  0x1a   :  { %s1469_s13 = smov 128   ;;  %s1470_s14 = smov 8  }
  0x1b   :  { %34 = dma.hbm_to_vmem [thread:$0]  %s1647_s0, 256, %s29_s29, [#allocation3], %s1469_s13, %s1469_s13, %s1470_s14  }
  0x1c   :  { %s1471_s3 = smov [#allocation7]  }
  0x1d   :  { %s62_s17 = sshll.u32 %s1471_s3, 4  ;;  %s63_s17 = int_to_ptr.vmem [resolvable:$true] %s62_s17 }
  0x1e   :  { %s1383_s18 = scalar_lea.vmem %s63_s17, 4096  ;;  %p1388_p11 = scmp.lt.s32.totalorder %s63_s17, %s63_s17 }
  0x1f   :  { %p1384_p10 = scmp.ne.s32.totalorder %s63_s17, %s1383_s18  ;;  %p1389_p12 = scmp.lt.s32.totalorder %s1383_s18, %s1383_s18 }
  0x21   :  { %p1390_p13 = por %p1389_p12, %p1388_p11 }
  0x23   :  { %p1391_p0 = pnand %p1390_p13, %p1384_p10 }
  0x25   :  { %1394 = shalt.err (!%p1391_p0)
}
  0x26   :  { %s1472_s19 = smov 256   ;;  %s1473_s20 = smov 16  }
  0x27   :  { %68 = dma.hbm_to_vmem [thread:$0]  %s1654_s7, 4096, %s63_s17, [#allocation6], %s1472_s19, %s1472_s19, %s1473_s20  }
  0x28   :  { %s1474_s23 = smov [#allocation8]  }
  0x29   :  { %s76_s26 = sshll.u32 %s1474_s23, 4  ;;  %s77_s26 = int_to_ptr.vmem [resolvable:$true] %s76_s26 }
  0x2a   :  { %s1403_s0 = scalar_lea.vmem %s77_s26, 4096  ;;  %p1408_p2 = scmp.lt.s32.totalorder %s77_s26, %s77_s26 }
  0x2b   :  { %p1404_p1 = scmp.ne.s32.totalorder %s77_s26, %s1403_s0  ;;  %p1409_p3 = scmp.lt.s32.totalorder %s1403_s0, %s1403_s0 }
  0x2d   :  { %p1410_p4 = por %p1409_p3, %p1408_p2 }
  0x2f   :  { %p1411_p5 = pnand %p1410_p4, %p1404_p1 }
  0x31   :  { %1414 = shalt.err (!%p1411_p5)
}
  0x32   :  { %82 = dma.hbm_to_vmem [thread:$0]  %s1656_s9, 4096, %s77_s26, [#allocation9], %s1466_s24, %s1466_s24, %s1467_s25  }
  0x33   :  { %1455 = dma.done.wait [#allocation3], 256  }
  0x34   :  { %1456 = vsyncadd [#allocation3], 4294967040 }
  0x35   :  { %1457 = dma.done.wait [#allocation6], 5120  }
  0x36   :  { %1458 = vsyncadd [#allocation6], 4294962176 }
  0x37   :  { %1459 = dma.done.wait [#allocation9], 4096  }
  0x38   :  { %1460 = vsyncadd [#allocation9], 4294963200  ;;  %v1566_v0 = vld [vmem:[#allocation2] sm:$0xff]  ;;  %v1568_v1 = vld [vmem:[#allocation2 + $0x8] sm:$0xff]  ;;  %v1475_v3 = vmov 0.0   ;;  %vm1476_vm0 = vmmov 0  }
  0x39   :  { %106 = vadd.xlane.f32.xlu0 %v1566_v0  ;;  %v1223_v2 = vld [vmem:[#allocation5 + $0x38] sm:$0xff]   ;;  %1188 = vmatprep.subr.bf16.mxu0 %v1475_v3  ;;  %v1224_v12 = vld [vmem:[#allocation5 + $0x30] sm:$0xff]   ;;  %v1225_v13 = vld [vmem:[#allocation5 + $0x28] sm:$0xff]  }
  0x3a   :  { %1189 = vmatpush3.bf16.msra.mxu0 %v1223_v2  ;;  %v1226_v14 = vld [vmem:[#allocation5 + $0x20] sm:$0xff]   ;;  %1204 = vmatprep.mubr.msk.bf16.mxu0 %vm1476_vm0, %v1475_v3  ;;  %v1227_v15 = vld [vmem:[#allocation5 + $0x18] sm:$0xff]   ;;  %v1228_v16 = vld [vmem:[#allocation5 + $0x10] sm:$0xff]  }
  0x3b   :  { %1190 = vmatprep.subr.bf16.mxu0 %v1475_v3  ;;  %v1229_v17 = vld [vmem:[#allocation5 + $0x8] sm:$0xff]   ;;  %v1230_v18 = vld [vmem:[#allocation5] sm:$0xff]   ;;  %v1057_v27 = vld [vmem:[%s1648_s1] ss:$0 sm:$0xff] }
  0x3c   :  { %v1058_v31 = vld [vmem:[%s1649_s2] ss:$0 sm:$0xff]  ;;  %v1231_v45 = vld [vmem:[#allocation7 + $0xe4] ss:$16 sps:$4 sm:$0xff]   ;;  %v1233_v46 = vld [vmem:[#allocation7 + $0xe8] ss:$16 sps:$4 sm:$0xff]  }
  0x3d   :  { %108 = vadd.xlane.f32.xlu0 %v1568_v1  ;;  %v1059_v36 = vld [vmem:[%s1651_s4] ss:$0 sm:$0xff]  ;;  %v1235_v47 = vld [vmem:[#allocation7 + $0xec] ss:$16 sps:$4 sm:$0xff]   ;;  %514 = vmatprep.subr.bf16.mxu1 %v1231_v45  ;;  %v1237_v57 = vld [vmem:[#allocation7 + $0xc4] ss:$16 sps:$4 sm:$0xff]  }
  0x3e   :  { %1191 = vmatpush3.bf16.msra.mxu0 %v1224_v12  ;;  %v1236_v48 = vld [vmem:[#allocation7 + $0xe0] ss:$16 sps:$4 sm:$0xff]   ;;  %v1241_v58 = vld [vmem:[#allocation7 + $0xcc] ss:$16 sps:$4 sm:$0xff]   ;;  %v1239_v59 = vld [vmem:[#allocation7 + $0xc8] ss:$16 sps:$4 sm:$0xff]  }
  0x3f   :  { %1192 = vmatprep.subr.bf16.mxu0 %v1475_v3  ;;  %515 = vmatpush1.bf16.msra.mxu1 %v1236_v48  ;;  %v1242_v60 = vld [vmem:[#allocation7 + $0xc0] ss:$16 sps:$4 sm:$0xff]   ;;  %v1243_v61 = vld [vmem:[#allocation7 + $0xa4] ss:$16 sps:$4 sm:$0xff]   ;;  %v1247_v62 = vld [vmem:[#allocation7 + $0xac] ss:$16 sps:$4 sm:$0xff]  }
  0x40   :  { %516 = vmatprep.subr.bf16.mxu1 %v1237_v57  ;;  %v1245_v63 = vld [vmem:[#allocation7 + $0xa8] ss:$16 sps:$4 sm:$0xff]   ;;  %v1266_v12 = vld [vmem:[#allocation7 + $0x40] ss:$16 sps:$4 sm:$0xff]  }
  0x41   :  { %v1251_v2 = vld [vmem:[#allocation7 + $0x88] ss:$16 sps:$4 sm:$0xff]   ;;  %v1285_v45 = vld [vmem:[#allocation8 + $0x30] sm:$0xff]  }
  0x42   :  { %1193 = vmatpush3.bf16.msra.mxu0 %v1225_v13  ;;  %v1267_v13 = vld [vmem:[#allocation7 + $0x24] ss:$16 sps:$4 sm:$0xff]   ;;  %v1288_v48 = vld [vmem:[#allocation8 + $0xe8] sm:$0xff]   ;;  %v1297_v57 = vld [vmem:[#allocation8 + $0x18] sm:$0xff]  }
  0x43   :  { %1194 = vmatprep.subr.bf16.mxu0 %v1475_v3  ;;  %517 = vmatpush1.bf16.msra.mxu1 %v1242_v60  ;;  %v1300_v60 = vld [vmem:[#allocation8 + $0xd0] sm:$0xff]  }
  0x44   :  { %518 = vmatprep.subr.bf16.mxu1 %v1243_v61  ;;  %v1301_v61 = vld [vmem:[#allocation8 + $0x10] sm:$0xff]  }
  0x46   :  { %1195 = vmatpush3.bf16.msra.mxu0 %v1226_v14  ;;  %v1271_v14 = vld [vmem:[#allocation7 + $0x2c] ss:$16 sps:$4 sm:$0xff]  }
  0x47   :  { %1196 = vmatprep.subr.bf16.mxu0 %v1475_v3 }
  0x4a   :  { %1197 = vmatpush3.bf16.msra.mxu0 %v1227_v15  ;;  %v1477_v15 = vmov 0  }
  0x4b   :  { %1198 = vmatprep.subr.bf16.mxu0 %v1475_v3  ;;  %546 = vmatprep.mubr.bf16.mxu1 %v1477_v15 }
  0x4e   :  { %1199 = vmatpush3.bf16.msra.mxu0 %v1228_v16  ;;  %v1269_v16 = vld [vmem:[#allocation7 + $0x28] ss:$16 sps:$4 sm:$0xff]  }
  0x4f   :  { %1200 = vmatprep.subr.bf16.mxu0 %v1475_v3 }
  0x52   :  { %1201 = vmatpush3.bf16.msra.mxu0 %v1229_v17  ;;  %v1272_v17 = vld [vmem:[#allocation7 + $0x20] ss:$16 sps:$4 sm:$0xff]  }
  0x53   :  { %1202 = vmatprep.subr.bf16.mxu0 %v1475_v3  ;;  %v1253_v3 = vld [vmem:[#allocation7 + $0x8c] ss:$16 sps:$4 sm:$0xff]  }
  0x56   :  { %1203 = vmatpush3.bf16.msra.mxu0 %v1230_v18  ;;  %v1273_v18 = vld [vmem:[#allocation7 + $0x4] ss:$16 sps:$4 sm:$0xff]  }
  0x57   :  { %557 = vmatprep.subr.bf16.mxu0 %v1235_v47  ;;  %v1287_v47 = vld [vmem:[#allocation8 + $0x68] sm:$0xff]  }
  0xc2   :  { %v107_v4 = vpop.xlane.xlu0 %106 }
  0xc3   :  { %v111_v5 = vmul.f32 0.0078125, %v107_v4  ;;  %v1254_v4 = vld [vmem:[#allocation7 + $0x80] ss:$16 sps:$4 sm:$0xff]  }
  0xc5   :  { %v113_v6 = vsub.f32 %v1566_v0, %v111_v5  ;;  %v1255_v5 = vld [vmem:[#allocation7 + $0x64] ss:$16 sps:$4 sm:$0xff]  }
  0xc6   :  { %v109_v7 = vpop.xlane.xlu0 %108 }
  0xc7   :  { %v112_v8 = vmul.f32 0.0078125, %v109_v7  ;;  %v115_v9 = vmul.f32 %v113_v6, %v113_v6  ;;  %v1257_v7 = vld [vmem:[#allocation7 + $0x68] ss:$16 sps:$4 sm:$0xff]  }
  0xc9   :  { %v114_v10 = vsub.f32 %v1568_v1, %v112_v8  ;;  %117 = vadd.xlane.f32.xlu1 %v115_v9  ;;  %v1260_v8 = vld [vmem:[#allocation7 + $0x60] ss:$16 sps:$4 sm:$0xff]   ;;  %v1261_v9 = vld [vmem:[#allocation7 + $0x44] ss:$16 sps:$4 sm:$0xff]  }
  0xcb   :  { %v116_v11 = vmul.f32 %v114_v10, %v114_v10 }
  0xcd   :  { %119 = vadd.xlane.f32.xlu1 %v116_v11  ;;  %v1263_v11 = vld [vmem:[#allocation7 + $0x48] ss:$16 sps:$4 sm:$0xff]  }
 0x152   :  { %v118_v19 = vpop.xlane.xlu1 %117 }
 0x153   :  { %v121_v20 = vmul.f32 0.0078125, %v118_v19  ;;  %v1277_v19 = vld [vmem:[#allocation7 + $0xc] ss:$16 sps:$4 sm:$0xff]  }
 0x155   :  { %v123_v21 = vadd.f32 1e-05, %v121_v20  ;;  %v1275_v20 = vld [vmem:[#allocation7 + $0x8] ss:$16 sps:$4 sm:$0xff]  }
 0x156   :  { %v120_v22 = vpop.xlane.xlu1 %119 }
 0x157   :  { %1311 = vrsqrt.f32 %v123_v21  ;;  %v122_v23 = vmul.f32 0.0078125, %v120_v22  ;;  %v1278_v21 = vld [vmem:[#allocation7] ss:$16 sps:$4 sm:$0xff]  }
 0x159   :  { %v124_v24 = vadd.f32 1e-05, %v122_v23 }
 0x15b   :  { %1313 = vrsqrt.f32 %v124_v24 }
 0x164   :  { %v1312_v25 = vpop.eup %1311 }
 0x165   :  { %v127_v26 = vmul.f32 %v1312_v25, %v113_v6  ;;  %v1259_v6 = vld [vmem:[#allocation7 + $0x6c] ss:$16 sps:$4 sm:$0xff]  }
 0x167   :  { %v135_v30 = vmul.f32 %v1057_v27, %v127_v26 }
 0x168   :  { %v1314_v28 = vpop.eup %1313 }
 0x169   :  { %v128_v29 = vmul.f32 %v1314_v28, %v114_v10  ;;  %v143_v33 = vadd.f32 %v1058_v31, %v135_v30  ;;  %v1265_v10 = vld [vmem:[#allocation7 + $0x4c] ss:$16 sps:$4 sm:$0xff]   ;;  %v1068_v30 = vld [vmem:[%s1652_s5] ss:$0 sm:$0xff] }
 0x16b   :  { %v136_v32 = vmul.f32 %v1057_v27, %v128_v29 }
 0x16d   :  { %v144_v34 = vadd.f32 %v1058_v31, %v136_v32 }
 0x16f   :  { %v145_v35 = vpack.c.bf16 %v144_v34, %v143_v33  ;;  %v1069_v34 = vld [vmem:[%s1653_s6] ss:$0 sm:$0xff] }
 0x171   :  { %1205 = vmatmul.mubr.bf16.vlgmr.msra.gmra.mxu0 %v145_v35 }
 0x172   :  { %558 = vmatpush1.bf16.msra.mxu0 %v1233_v46  ;;  %589 = vmatprep.mubr.bf16.mxu0 %v1477_v15  ;;  %v1286_v46 = vld [vmem:[#allocation8 + $0xb0] sm:$0xff]  }
 0x173   :  { %559 = vmatprep.subr.bf16.mxu0 %v1241_v58  ;;  %v1298_v58 = vld [vmem:[#allocation8 + $0x98] sm:$0xff]  }
 0x176   :  { %560 = vmatpush1.bf16.msra.mxu0 %v1239_v59  ;;  %v1299_v59 = vld [vmem:[#allocation8 + $0x50] sm:$0xff]  }
 0x177   :  { %561 = vmatprep.subr.bf16.mxu0 %v1247_v62  ;;  %v1302_v62 = vld [vmem:[#allocation8 + $0x90] sm:$0xff]  }
 0x17a   :  { %562 = vmatpush1.bf16.msra.mxu0 %v1245_v63  ;;  %v1303_v63 = vld [vmem:[#allocation8 + $0x48] sm:$0xff]  }
 0x17b   :  { %563 = vmatprep.subr.bf16.mxu0 %v1253_v3  ;;  %v1307_v3 = vld [vmem:[#allocation8 + $0x40] sm:$0xff]  }
 0x17e   :  { %564 = vmatpush1.bf16.msra.mxu0 %v1251_v2  ;;  %v1306_v2 = vld [vmem:[#allocation8 + $0x88] sm:$0xff]  }
 0x17f   :  { %565 = vmatprep.subr.bf16.mxu0 %v1259_v6  ;;  %v1310_v6 = vld [vmem:[#allocation8 + $0x80] sm:$0xff]  }
 0x182   :  { %566 = vmatpush1.bf16.msra.mxu0 %v1257_v7  ;;  %v334_v7 = vlaneseq }
 0x183   :  { %567 = vmatprep.subr.bf16.mxu0 %v1265_v10 }
 0x186   :  { %568 = vmatpush1.bf16.msra.mxu0 %v1263_v11  ;;  %v332_v11 = vld [vmem:[%s1655_s8] sm:$0xf]  ;;  %s1478_s8 = smov [#allocation11]  }
 0x187   :  { %569 = vmatprep.subr.bf16.mxu0 %v1271_v14  ;;  %s1039_s16 = sshll.u32 %s1478_s8, 4  ;;  %s1040_s16 = int_to_ptr.vmem [resolvable:$true] %s1039_s16 }
 0x188   :  { %s1415_s3 = scalar_lea.vmem %s1040_s16, 256  ;;  %p1420_p7 = scmp.lt.s32.totalorder %s1040_s16, %s1040_s16 }
 0x189   :  { %p1416_p6 = scmp.ne.s32.totalorder %s1040_s16, %s1415_s3  ;;  %p1421_p8 = scmp.lt.s32.totalorder %s1415_s3, %s1415_s3 }
 0x18a   :  { %570 = vmatpush1.bf16.msra.mxu0 %v1269_v16 }
 0x18b   :  { %571 = vmatprep.subr.bf16.mxu0 %v1277_v19  ;;  %p1422_p9 = por %p1421_p8, %p1420_p7 }
 0x18d   :  { %p1423_p10 = pnand %p1422_p9, %p1416_p6 }
 0x18e   :  { %572 = vmatpush1.bf16.msra.mxu0 %v1275_v20 }
 0x231   :  { %v250_v37 = vpop.f32.mrf.mxu0 }
 0x232   :  { %v251_v38 = vadd.f32 %v1059_v36, %v250_v37 }
 0x233   :  { %v1206_v39 = vpop.f32.mrf.mxu0 }
 0x234   :  { %v257_v40 = vadd.f32 %v251_v38, %v1566_v0  ;;  %v1248_v0 = vld [vmem:[#allocation7 + $0xa0] ss:$16 sps:$4 sm:$0xff]   ;;  %v1279_v39 = vld [vmem:[#allocation8 + $0x78] sm:$0xff]  }
 0x235   :  { %v253_v41 = vpop.f32.mrf.mxu0  ;;  %519 = vmatpush1.bf16.msra.mxu1 %v1248_v0  ;;  %v1304_v0 = vld [vmem:[#allocation8 + $0xc8] sm:$0xff]  }
 0x236   :  { %259 = vst [vmem:[#allocation11] sm:$0xff] %v257_v40  ;;  %v254_v42 = vadd.f32 %v1059_v36, %v253_v41  ;;  %261 = vadd.xlane.f32.xlu0 %v257_v40  ;;  %v1281_v41 = vld [vmem:[#allocation8 + $0x38] sm:$0xff]  }
 0x237   :  { %v1207_v43 = vpop.f32.mrf.mxu0 }
 0x238   :  { %v258_v44 = vadd.f32 %v254_v42, %v1568_v1  ;;  %v1249_v1 = vld [vmem:[#allocation7 + $0x84] ss:$16 sps:$4 sm:$0xff]   ;;  %v1282_v42 = vld [vmem:[#allocation8 + $0xb8] sm:$0xff]  }
 0x239   :  { %520 = vmatprep.subr.bf16.mxu1 %v1249_v1  ;;  %v1283_v43 = vld [vmem:[#allocation8 + $0x70] sm:$0xff]   ;;  %v1305_v1 = vld [vmem:[#allocation8 + $0x8] sm:$0xff]  }
 0x23a   :  { %260 = vst [vmem:[#allocation11 + $0x8] sm:$0xff] %v258_v44  ;;  %263 = vadd.xlane.f32.xlu1 %v258_v44  ;;  %521 = vmatpush1.bf16.msra.mxu1 %v1254_v4  ;;  %v1308_v4 = vld [vmem:[#allocation8 + $0xc0] sm:$0xff]  }
 0x23b   :  { %522 = vmatprep.subr.bf16.mxu1 %v1255_v5  ;;  %v1309_v5 = vld [vmem:[#allocation8] sm:$0xff]  }
 0x23e   :  { %523 = vmatpush1.bf16.msra.mxu1 %v1260_v8  ;;  %v335_v8 = vshrl.u32 %v334_v7, 7 }
 0x23f   :  { %524 = vmatprep.subr.bf16.mxu1 %v1261_v9 }
 0x240   :  { %v336_v9 = vsub.s32 0, %v335_v8  ;;  %v344_v10 = vsub.s32 2, %v335_v8 }
 0x242   :  { %525 = vmatpush1.bf16.msra.mxu1 %v1266_v12  ;;  %v340_v12 = vsub.s32 1, %v335_v8  ;;  %v337_v14 = vrot.slane %v332_v11, %v336_v9  ;;  %v345_v15 = vrot.slane %v332_v11, %v344_v10 }
 0x243   :  { %526 = vmatprep.subr.bf16.mxu1 %v1267_v13  ;;  %v348_v13 = vsub.s32 3, %v335_v8 }
 0x244   :  { %v341_v16 = vrot.slane %v332_v11, %v340_v12 }
 0x246   :  { %527 = vmatpush1.bf16.msra.mxu1 %v1272_v17  ;;  %v349_v17 = vrot.slane %v332_v11, %v348_v13 }
 0x247   :  { %528 = vmatprep.subr.bf16.mxu1 %v1273_v18 }
 0x24a   :  { %529 = vmatpush1.bf16.msra.mxu1 %v1278_v21 }
 0x24b   :  { %1144 = vmatprep.subr.bf16.mxu1 %v1279_v39 }
 0x2bf   :  { %v262_v49 = vpop.xlane.xlu0 %261 }
 0x2c0   :  { %v265_v50 = vmul.f32 0.0078125, %v262_v49  ;;  %v1289_v49 = vld [vmem:[#allocation8 + $0x28] sm:$0xff]  }
 0x2c2   :  { %v1585_v51 = vsub.f32 %v257_v40, %v265_v50  ;;  %v1280_v40 = vld [vmem:[#allocation8 + $0xf8] sm:$0xff]   ;;  %v1290_v50 = vld [vmem:[#allocation8 + $0xa8] sm:$0xff]  }
 0x2c3   :  { %v264_v52 = vpop.xlane.xlu1 %263  ;;  %1166 = vmatprep.subr.bf16.mxu0 %v1280_v40 }
 0x2c4   :  { %v266_v53 = vmul.f32 0.0078125, %v264_v52  ;;  %v269_v54 = vmul.f32 %v1585_v51, %v1585_v51  ;;  %v1292_v52 = vld [vmem:[#allocation8 + $0xe0] sm:$0xff]  }
 0x2c6   :  { %v1589_v55 = vsub.f32 %v258_v44, %v266_v53  ;;  %271 = vadd.xlane.f32.xlu0 %v269_v54  ;;  %v1284_v44 = vld [vmem:[#allocation8 + $0xf0] sm:$0xff]   ;;  %v1293_v53 = vld [vmem:[#allocation8 + $0x20] sm:$0xff]  }
 0x2c7   :  { %v1294_v54 = vld [vmem:[#allocation8 + $0xa0] sm:$0xff]  }
 0x2c8   :  { %v270_v56 = vmul.f32 %v1589_v55, %v1589_v55 }
 0x2ca   :  { %273 = vadd.xlane.f32.xlu1 %v270_v56  ;;  %v1296_v56 = vld [vmem:[#allocation8 + $0xd8] sm:$0xff]  }
 0x34f   :  { %v272_v22 = vpop.xlane.xlu0 %271 }
 0x350   :  { %v275_v23 = vmul.f32 0.0078125, %v272_v22 }
 0x352   :  { %v277_v24 = vadd.f32 1e-05, %v275_v23 }
 0x353   :  { %v274_v25 = vpop.xlane.xlu1 %273 }
 0x354   :  { %1315 = vrsqrt.f32 %v277_v24  ;;  %v276_v26 = vmul.f32 0.0078125, %v274_v25 }
 0x356   :  { %v278_v27 = vadd.f32 1e-05, %v276_v26 }
 0x358   :  { %1317 = vrsqrt.f32 %v278_v27 }
 0x361   :  { %v1316_v28 = vpop.eup %1315 }
 0x362   :  { %v281_v29 = vmul.f32 %v1316_v28, %v1585_v51  ;;  %v1291_v51 = vld [vmem:[#allocation8 + $0x60] sm:$0xff]  }
 0x364   :  { %v289_v33 = vmul.f32 %v1068_v30, %v281_v29 }
 0x365   :  { %v1318_v31 = vpop.eup %1317 }
 0x366   :  { %v282_v32 = vmul.f32 %v1318_v31, %v1589_v55  ;;  %v297_v36 = vadd.f32 %v1069_v34, %v289_v33  ;;  %v1295_v55 = vld [vmem:[#allocation8 + $0x58] sm:$0xff]  }
 0x368   :  { %v290_v35 = vmul.f32 %v1068_v30, %v282_v32 }
 0x36a   :  { %v298_v37 = vadd.f32 %v1069_v34, %v290_v35 }
 0x36c   :  { %v299_v38 = vpack.c.bf16 %v298_v37, %v297_v36 }
 0x36e   :  { %547 = vmatmul.mubr.bf16.vlgmr.msra.gmra.mxu1 %v299_v38  ;;  %590 = vmatmul.mubr.bf16.vlgmr.msra.gmra.mxu0 %v299_v38 }
 0x36f   :  { %1145 = vmatpush3.bf16.msra.mxu1 %v1281_v41  ;;  %1167 = vmatpush3.bf16.msra.mxu0 %v1282_v42 }
 0x370   :  { %1146 = vmatprep.subr.bf16.mxu1 %v1283_v43  ;;  %1168 = vmatprep.subr.bf16.mxu0 %v1284_v44 }
 0x373   :  { %1147 = vmatpush3.bf16.msra.mxu1 %v1285_v45  ;;  %1169 = vmatpush3.bf16.msra.mxu0 %v1286_v46 }
 0x374   :  { %1148 = vmatprep.subr.bf16.mxu1 %v1287_v47  ;;  %1170 = vmatprep.subr.bf16.mxu0 %v1288_v48 }
 0x377   :  { %1149 = vmatpush3.bf16.msra.mxu1 %v1289_v49  ;;  %1171 = vmatpush3.bf16.msra.mxu0 %v1290_v50 }
 0x378   :  { %1150 = vmatprep.subr.bf16.mxu1 %v1291_v51  ;;  %1172 = vmatprep.subr.bf16.mxu0 %v1292_v52 }
 0x37b   :  { %1151 = vmatpush3.bf16.msra.mxu1 %v1293_v53  ;;  %1173 = vmatpush3.bf16.msra.mxu0 %v1294_v54 }
 0x37c   :  { %1152 = vmatprep.subr.bf16.mxu1 %v1295_v55  ;;  %1174 = vmatprep.subr.bf16.mxu0 %v1296_v56 }
 0x37f   :  { %1153 = vmatpush3.bf16.msra.mxu1 %v1297_v57  ;;  %1175 = vmatpush3.bf16.msra.mxu0 %v1298_v58 }
 0x380   :  { %1154 = vmatprep.subr.bf16.mxu1 %v1299_v59  ;;  %1176 = vmatprep.subr.bf16.mxu0 %v1300_v60 }
 0x383   :  { %1155 = vmatpush3.bf16.msra.mxu1 %v1301_v61  ;;  %1177 = vmatpush3.bf16.msra.mxu0 %v1302_v62 }
 0x384   :  { %1156 = vmatprep.subr.bf16.mxu1 %v1303_v63  ;;  %1178 = vmatprep.subr.bf16.mxu0 %v1304_v0 }
 0x387   :  { %1157 = vmatpush3.bf16.msra.mxu1 %v1305_v1  ;;  %1179 = vmatpush3.bf16.msra.mxu0 %v1306_v2 }
 0x388   :  { %1158 = vmatprep.subr.bf16.mxu1 %v1307_v3  ;;  %1180 = vmatprep.subr.bf16.mxu0 %v1308_v4 }
 0x38b   :  { %1159 = vmatpush3.bf16.msra.mxu1 %v1309_v5  ;;  %1181 = vmatpush3.bf16.msra.mxu0 %v1310_v6 }
 0x42e   :  { %v548_v18 = vpop.f32.mrf.mxu1  ;;  %v591_v19 = vpop.f32.mrf.mxu0 }
 0x42f   :  { %v1604_v20 = vadd.f32 %v548_v18, %v337_v14  ;;  %v1606_v21 = vadd.f32 %v591_v19, %v345_v15 }
 0x430   :  { %v550_v22 = vpop.f32.mrf.mxu1  ;;  %v593_v23 = vpop.f32.mrf.mxu0 }
 0x431   :  { %v608_v24 = vmul.f32 0.044715, %v1604_v20  ;;  %v610_v25 = vmul.f32 0.044715, %v1606_v21  ;;  %v551_v26 = vadd.f32 %v550_v22, %v341_v16  ;;  %v1610_v27 = vadd.f32 %v593_v23, %v349_v17 }
 0x432   :  { %v552_v28 = vpop.f32.mrf.mxu1  ;;  %v595_v29 = vpop.f32.mrf.mxu0  ;;  %v600_v18 = vmul.f32 0.5, %v1604_v20 }
 0x433   :  { %v616_v30 = vmul.f32 %v608_v24, %v1604_v20  ;;  %v618_v31 = vmul.f32 %v610_v25, %v1606_v21  ;;  %v609_v32 = vmul.f32 0.044715, %v551_v26  ;;  %v611_v33 = vmul.f32 0.044715, %v1610_v27 }
 0x434   :  { %v553_v34 = vadd.f32 %v552_v28, %v337_v14  ;;  %v1615_v35 = vadd.f32 %v595_v29, %v345_v15  ;;  %v554_v36 = vpop.f32.mrf.mxu1  ;;  %v597_v37 = vpop.f32.mrf.mxu0 }
 0x435   :  { %v624_v38 = vmul.f32 %v616_v30, %v1604_v20  ;;  %v626_v39 = vmul.f32 %v618_v31, %v1606_v21  ;;  %v617_v40 = vmul.f32 %v609_v32, %v551_v26  ;;  %v619_v41 = vmul.f32 %v611_v33, %v1610_v27 }
 0x436   :  { %v612_v42 = vmul.f32 0.044715, %v553_v34  ;;  %v614_v43 = vmul.f32 0.044715, %v1615_v35  ;;  %v555_v44 = vadd.f32 %v554_v36, %v341_v16  ;;  %v598_v45 = vadd.f32 %v597_v37, %v349_v17 }
 0x437   :  { %v632_v46 = vadd.f32 %v624_v38, %v1604_v20  ;;  %v634_v47 = vadd.f32 %v626_v39, %v1606_v21  ;;  %v625_v48 = vmul.f32 %v617_v40, %v551_v26  ;;  %v627_v49 = vmul.f32 %v619_v41, %v1610_v27 }
 0x438   :  { %v620_v50 = vmul.f32 %v612_v42, %v553_v34  ;;  %v622_v51 = vmul.f32 %v614_v43, %v1615_v35  ;;  %v613_v52 = vmul.f32 0.044715, %v555_v44  ;;  %v615_v53 = vmul.f32 0.044715, %v598_v45 }
 0x439   :  { %v640_v54 = vmul.f32 0.7978846, %v632_v46  ;;  %v642_v55 = vmul.f32 0.7978846, %v634_v47  ;;  %v633_v56 = vadd.f32 %v625_v48, %v551_v26  ;;  %v635_v62 = vadd.f32 %v627_v49, %v1610_v27 }
 0x43a   :  { %v628_v57 = vmul.f32 %v620_v50, %v553_v34  ;;  %v630_v58 = vmul.f32 %v622_v51, %v1615_v35  ;;  %v621_v59 = vmul.f32 %v613_v52, %v555_v44  ;;  %v623_v60 = vmul.f32 %v615_v53, %v598_v45 }
 0x43b   :  { %v641_v61 = vmul.f32 0.7978846, %v633_v56  ;;  %1319 = vtanh.f32 %v640_v54  ;;  %v643_v3 = vmul.f32 0.7978846, %v635_v62  ;;  %v601_v16 = vmul.f32 0.5, %v551_v26 }
 0x43c   :  { %v636_v63 = vadd.f32 %v628_v57, %v553_v34  ;;  %v638_v0 = vadd.f32 %v630_v58, %v1615_v35  ;;  %v629_v1 = vmul.f32 %v621_v59, %v555_v44  ;;  %1321 = vtanh.f32 %v642_v55 }
 0x43d   :  { %v631_v2 = vmul.f32 %v623_v60, %v598_v45  ;;  %1323 = vtanh.f32 %v641_v61  ;;  %v604_v24 = vmul.f32 0.5, %v553_v34  ;;  %v605_v30 = vmul.f32 0.5, %v555_v44 }
 0x43e   :  { %v644_v4 = vmul.f32 0.7978846, %v636_v63  ;;  %v646_v5 = vmul.f32 0.7978846, %v638_v0  ;;  %v637_v6 = vadd.f32 %v629_v1, %v555_v44  ;;  %1325 = vtanh.f32 %v643_v3 }
 0x43f   :  { %v639_v7 = vadd.f32 %v631_v2, %v598_v45  ;;  %v606_v32 = vmul.f32 0.5, %v1615_v35  ;;  %v603_v36 = vmul.f32 0.5, %v1610_v27  ;;  %v607_v37 = vmul.f32 0.5, %v598_v45 }
 0x440   :  { %1327 = vtanh.f32 %v644_v4  ;;  %v645_v8 = vmul.f32 0.7978846, %v637_v6  ;;  %v602_v20 = vmul.f32 0.5, %v1606_v21 }
 0x441   :  { %1329 = vtanh.f32 %v646_v5  ;;  %v647_v9 = vmul.f32 0.7978846, %v639_v7 }
 0x442   :  { %1331 = vtanh.f32 %v645_v8 }
 0x443   :  { %1333 = vtanh.f32 %v647_v9 }
 0x448   :  { %v1320_v10 = vpop.eup %1319 }
 0x449   :  { %v1322_v11 = vpop.eup %1321  ;;  %v656_v25 = vadd.f32 1.0, %v1320_v10 }
 0x44a   :  { %v1324_v12 = vpop.eup %1323  ;;  %v658_v33 = vadd.f32 1.0, %v1322_v11 }
 0x44b   :  { %v1326_v13 = vpop.eup %1325  ;;  %v657_v17 = vadd.f32 1.0, %v1324_v12  ;;  %v664_v43 = vmul.f32 %v656_v25, %v600_v18 }
 0x44c   :  { %v659_v23 = vadd.f32 1.0, %v1326_v13  ;;  %v666_v47 = vmul.f32 %v658_v33, %v602_v20 }
 0x44d   :  { %v1328_v14 = vpop.eup %1327  ;;  %v665_v39 = vmul.f32 %v657_v17, %v601_v16 }
 0x44e   :  { %v1330_v15 = vpop.eup %1329  ;;  %v660_v19 = vadd.f32 1.0, %v1328_v14  ;;  %v667_v42 = vmul.f32 %v659_v23, %v603_v36 }
 0x44f   :  { %v1332_v22 = vpop.eup %1331  ;;  %v662_v28 = vadd.f32 1.0, %v1330_v15 }
 0x450   :  { %v1334_v29 = vpop.eup %1333  ;;  %v661_v31 = vadd.f32 1.0, %v1332_v22  ;;  %v668_v26 = vmul.f32 %v660_v19, %v604_v24 }
 0x451   :  { %v663_v38 = vadd.f32 1.0, %v1334_v29  ;;  %v670_v41 = vmul.f32 %v662_v28, %v606_v32 }
 0x452   :  { %v669_v40 = vmul.f32 %v661_v31, %v605_v30  ;;  %v672_v48 = vpack.c.bf16 %v668_v26, %v664_v43 }
 0x453   :  { %v671_v34 = vmul.f32 %v663_v38, %v607_v37  ;;  %v674_v35 = vpack.c.bf16 %v670_v41, %v666_v47 }
 0x454   :  { %v673_v46 = vpack.c.bf16 %v669_v40, %v665_v39 }
 0x455   :  { %v675_v44 = vpack.c.bf16 %v671_v34, %v667_v42 }
 0x456   :  { %970 = vmatprep.mubr.bf16.mxu1 %v673_v46 }
 0x457   :  { %1011 = vmatprep.mubr.bf16.mxu0 %v675_v44  ;;  %971 = vmatmul.mubr.bf16.vlgmr.msra.gmra.mxu1 %v672_v48 }
 0x458   :  { %1012 = vmatmul.mubr.bf16.vlgmr.msra.gmra.mxu0 %v674_v35 }
 0x459   :  { %1426 = shalt.err (!%p1423_p10)
}
 0x45a   :  { %1045 = dma.vmem_to_hbm [thread:$0]  %s1040_s16, 256, %s1659_s12, [#allocation12], %s1469_s13, %s1469_s13, %s1470_s14  }
 0x45b   :  { %v1102_v45 = vld [vmem:[%s1657_s10] ss:$0 sm:$0xff]  ;;  %s1479_s21 = smov [#allocation10]  }
 0x45c   :  { %s1027_s22 = sshll.u32 %s1479_s21, 4  ;;  %s1028_s22 = int_to_ptr.vmem [resolvable:$true] %s1027_s22 }
 0x45d   :  { %s1435_s10 = scalar_lea.vmem %s1028_s22, 256  ;;  %p1440_p12 = scmp.lt.s32.totalorder %s1028_s22, %s1028_s22 }
 0x45e   :  { %p1436_p11 = scmp.ne.s32.totalorder %s1028_s22, %s1435_s10  ;;  %p1441_p13 = scmp.lt.s32.totalorder %s1435_s10, %s1435_s10 }
 0x460   :  { %p1442_p0 = por %p1441_p13, %p1440_p12 }
 0x462   :  { %p1443_p1 = pnand %p1442_p0, %p1436_p11 }
 0x517   :  { %v1160_v21 = vpop.f32.mrf.mxu1 }
 0x518   :  { %v1182_v27 = vpop.f32.mrf.mxu0 }
 0x519   :  { %v1161_v49 = vpop.f32.mrf.mxu1 }
 0x51a   :  { %v1162_v50 = vadd.f32 %v1161_v49, %v1160_v21  ;;  %v1183_v51 = vpop.f32.mrf.mxu0 }
 0x51b   :  { %v1163_v52 = vpop.f32.mrf.mxu1  ;;  %v1184_v54 = vadd.f32 %v1183_v51, %v1182_v27 }
 0x51c   :  { %v973_v53 = vadd.f32 %v1162_v50, %v1102_v45  ;;  %v1185_v55 = vpop.f32.mrf.mxu0 }
 0x51d   :  { %v1164_v56 = vpop.f32.mrf.mxu1 }
 0x51e   :  { %v1014_v57 = vadd.f32 %v1184_v54, %v973_v53  ;;  %v1165_v58 = vadd.f32 %v1164_v56, %v1163_v52  ;;  %v1186_v59 = vpop.f32.mrf.mxu0 }
 0x51f   :  { %v1187_v61 = vadd.f32 %v1186_v59, %v1185_v55 }
 0x520   :  { %1020 = vst [vmem:[#allocation10] sm:$0xff] %v1014_v57  ;;  %v976_v60 = vadd.f32 %v1165_v58, %v1102_v45 }
 0x522   :  { %v1017_v62 = vadd.f32 %v1187_v61, %v976_v60 }
 0x524   :  { %1021 = vst [vmem:[#allocation10 + $0x8] sm:$0xff] %v1017_v62 }
 0x525   :  { %1446 = shalt.err (!%p1443_p1)
}
 0x526   :  { %1033 = dma.vmem_to_hbm [thread:$0]  %s1028_s22, 256, %s1658_s11, [#allocation4], %s1469_s13, %s1469_s13, %s1470_s14  }
 0x527   :  { %1461 = dma.done.wait [#allocation4], 256  }
 0x528   :  { %1462 = vsyncadd [#allocation4], 4294967040 }
 0x529   :  { %1463 = dma.done.wait [#allocation12], 256  }
 0x52a   :  { %1464 = vsyncadd [#allocation12], 4294967040 }
 0x52b   :  { %1052 = vsyncpa [#allocation3], 1 }
 0x52c   :  { %1053 = vsyncpa [#allocation6], 1 }
 0x52d   :  { %1054 = vsyncpa [#allocation9], 1 }
 0x52e   :  { %1055 = vsyncpa [#allocation4], 1 }
 0x52f   :  { %1056 = vsyncpa [#allocation12], 1 }

// kernel: tpu_custom_call.1
= control target key start
LH: loop header
LB: loop body
LE: loop exit
PB: predicated region body
PF: predicated region fallthrough
CT: control target
= control target key end

     0   :  { %18 = vsyncpa [#allocation3], 0  ;;  %s1647_s0 = inlined_call_operand.hbm [shape: f32[16,128], index: 0, kind: input, shape index: {}]   ;;  %s1648_s1 = inlined_call_operand.vmem [shape: f32[1,128], index: 1, kind: input, shape index: {}]   ;;  %s1649_s2 = inlined_call_operand.vmem [shape: f32[1,128], index: 2, kind: input, shape index: {}]   ;;  %s1650_s3 = inlined_call_operand.hbm [shape: bf16[128,128], index: 3, kind: input, shape index: {}]   ;;  %s1651_s4 = inlined_call_operand.vmem [shape: f32[1,128], index: 4, kind: input, shape index: {}]   ;;  %s1652_s5 = inlined_call_operand.vmem [shape: f32[1,128], index: 5, kind: input, shape index: {}]   ;;  %s1653_s6 = inlined_call_operand.vmem [shape: f32[1,128], index: 6, kind: input, shape index: {}]   ;;  %s1654_s7 = inlined_call_operand.hbm [shape: bf16[128,512], index: 7, kind: input, shape index: {}]   ;;  %s1655_s8 = inlined_call_operand.vmem [shape: f32[1,512], index: 8, kind: input, shape index: {}]   ;;  %s1656_s9 = inlined_call_operand.hbm [shape: bf16[512,128], index: 9, kind: input, shape index: {}]   ;;  %s1657_s10 = inlined_call_operand.vmem [shape: f32[1,128], index: 10, kind: input, shape index: {}]   ;;  %s1658_s11 = inlined_call_operand.hbm [shape: f32[16,128], index: 11, kind: output, shape index: {0}]   ;;  %s1659_s12 = inlined_call_operand.hbm [shape: f32[16,128], index: 12, kind: output, shape index: {1}]  }
   0x1   :  { %19 = vsyncpa [#allocation6], 0 }
   0x2   :  { %20 = vsyncpa [#allocation9], 0 }
   0x3   :  { %21 = vsyncpa [#allocation4], 0 }
   0x4   :  { %22 = vsyncpa [#allocation12], 0  ;;  %s1465_s21 = smov [#allocation5]  }
   0x5   :  { %s44_s22 = sshll.u32 %s1465_s21, 4  ;;  %s45_s22 = int_to_ptr.vmem [resolvable:$true] %s44_s22 }
   0x6   :  { %s1343_s23 = scalar_lea.vmem %s45_s22, 1024  ;;  %p1348_p1 = scmp.lt.s32.totalorder %s45_s22, %s45_s22 }
   0x7   :  { %p1344_p0 = scmp.ne.s32.totalorder %s45_s22, %s1343_s23  ;;  %p1349_p2 = scmp.lt.s32.totalorder %s1343_s23, %s1343_s23 }
   0x9   :  { %p1350_p3 = por %p1349_p2, %p1348_p1 }
   0xb   :  { %p1351_p4 = pnand %p1350_p3, %p1344_p0 }
   0xd   :  { %1354 = shalt.err (!%p1351_p4)
}
   0xe   :  { %s1466_s24 = smov 64   ;;  %s1467_s25 = smov 4  }
   0xf   :  { %50 = dma.hbm_to_vmem [thread:$0]  %s1650_s3, 1024, %s45_s22, [#allocation6], %s1466_s24, %s1466_s24, %s1467_s25  }
  0x10   :  { %s1468_s28 = smov [#allocation2]  }
  0x11   :  { %s28_s29 = sshll.u32 %s1468_s28, 4  ;;  %s29_s29 = int_to_ptr.vmem [resolvable:$true] %s28_s29 }
  0x12   :  { %s1363_s30 = scalar_lea.vmem %s29_s29, 256  ;;  %p1368_p6 = scmp.lt.s32.totalorder %s29_s29, %s29_s29 }
  0x13   :  { %p1364_p5 = scmp.ne.s32.totalorder %s29_s29, %s1363_s30  ;;  %p1369_p7 = scmp.lt.s32.totalorder %s1363_s30, %s1363_s30 }
  0x15   :  { %p1370_p8 = por %p1369_p7, %p1368_p6 }
  0x17   :  { %p1371_p9 = pnand %p1370_p8, %p1364_p5 }
  0x19   :  { %1374 = shalt.err (!%p1371_p9)
}
  0x1a   :  { %s1469_s13 = smov 128   ;;  %s1470_s14 = smov 8  }
  0x1b   :  { %34 = dma.hbm_to_vmem [thread:$0]  %s1647_s0, 256, %s29_s29, [#allocation3], %s1469_s13, %s1469_s13, %s1470_s14  }
  0x1c   :  { %s1471_s3 = smov [#allocation7]  }
  0x1d   :  { %s62_s17 = sshll.u32 %s1471_s3, 4  ;;  %s63_s17 = int_to_ptr.vmem [resolvable:$true] %s62_s17 }
  0x1e   :  { %s1383_s18 = scalar_lea.vmem %s63_s17, 4096  ;;  %p1388_p11 = scmp.lt.s32.totalorder %s63_s17, %s63_s17 }
  0x1f   :  { %p1384_p10 = scmp.ne.s32.totalorder %s63_s17, %s1383_s18  ;;  %p1389_p12 = scmp.lt.s32.totalorder %s1383_s18, %s1383_s18 }
  0x21   :  { %p1390_p13 = por %p1389_p12, %p1388_p11 }
  0x23   :  { %p1391_p0 = pnand %p1390_p13, %p1384_p10 }
  0x25   :  { %1394 = shalt.err (!%p1391_p0)
}
  0x26   :  { %s1472_s19 = smov 256   ;;  %s1473_s20 = smov 16  }
  0x27   :  { %68 = dma.hbm_to_vmem [thread:$0]  %s1654_s7, 4096, %s63_s17, [#allocation6], %s1472_s19, %s1472_s19, %s1473_s20  }
  0x28   :  { %s1474_s23 = smov [#allocation8]  }
  0x29   :  { %s76_s26 = sshll.u32 %s1474_s23, 4  ;;  %s77_s26 = int_to_ptr.vmem [resolvable:$true] %s76_s26 }
  0x2a   :  { %s1403_s0 = scalar_lea.vmem %s77_s26, 4096  ;;  %p1408_p2 = scmp.lt.s32.totalorder %s77_s26, %s77_s26 }
  0x2b   :  { %p1404_p1 = scmp.ne.s32.totalorder %s77_s26, %s1403_s0  ;;  %p1409_p3 = scmp.lt.s32.totalorder %s1403_s0, %s1403_s0 }
  0x2d   :  { %p1410_p4 = por %p1409_p3, %p1408_p2 }
  0x2f   :  { %p1411_p5 = pnand %p1410_p4, %p1404_p1 }
  0x31   :  { %1414 = shalt.err (!%p1411_p5)
}
  0x32   :  { %82 = dma.hbm_to_vmem [thread:$0]  %s1656_s9, 4096, %s77_s26, [#allocation9], %s1466_s24, %s1466_s24, %s1467_s25  }
  0x33   :  { %1455 = dma.done.wait [#allocation3], 256  }
  0x34   :  { %1456 = vsyncadd [#allocation3], 4294967040 }
  0x35   :  { %1457 = dma.done.wait [#allocation6], 5120  }
  0x36   :  { %1458 = vsyncadd [#allocation6], 4294962176 }
  0x37   :  { %1459 = dma.done.wait [#allocation9], 4096  }
  0x38   :  { %1460 = vsyncadd [#allocation9], 4294963200  ;;  %v1566_v0 = vld [vmem:[#allocation2] sm:$0xff]  ;;  %v1568_v1 = vld [vmem:[#allocation2 + $0x8] sm:$0xff]  ;;  %v1475_v3 = vmov 0.0   ;;  %vm1476_vm0 = vmmov 0  }
  0x39   :  { %106 = vadd.xlane.f32.xlu0 %v1566_v0  ;;  %v1223_v2 = vld [vmem:[#allocation5 + $0x38] sm:$0xff]   ;;  %1188 = vmatprep.subr.bf16.mxu0 %v1475_v3  ;;  %v1224_v12 = vld [vmem:[#allocation5 + $0x30] sm:$0xff]   ;;  %v1225_v13 = vld [vmem:[#allocation5 + $0x28] sm:$0xff]  }
  0x3a   :  { %1189 = vmatpush3.bf16.msra.mxu0 %v1223_v2  ;;  %v1226_v14 = vld [vmem:[#allocation5 + $0x20] sm:$0xff]   ;;  %1204 = vmatprep.mubr.msk.bf16.mxu0 %vm1476_vm0, %v1475_v3  ;;  %v1227_v15 = vld [vmem:[#allocation5 + $0x18] sm:$0xff]   ;;  %v1228_v16 = vld [vmem:[#allocation5 + $0x10] sm:$0xff]  }
  0x3b   :  { %1190 = vmatprep.subr.bf16.mxu0 %v1475_v3  ;;  %v1229_v17 = vld [vmem:[#allocation5 + $0x8] sm:$0xff]   ;;  %v1230_v18 = vld [vmem:[#allocation5] sm:$0xff]   ;;  %v1057_v27 = vld [vmem:[%s1648_s1] ss:$0 sm:$0xff] }
  0x3c   :  { %v1058_v31 = vld [vmem:[%s1649_s2] ss:$0 sm:$0xff]  ;;  %v1231_v45 = vld [vmem:[#allocation7 + $0xe4] ss:$16 sps:$4 sm:$0xff]   ;;  %v1233_v46 = vld [vmem:[#allocation7 + $0xe8] ss:$16 sps:$4 sm:$0xff]  }
  0x3d   :  { %108 = vadd.xlane.f32.xlu0 %v1568_v1  ;;  %v1059_v36 = vld [vmem:[%s1651_s4] ss:$0 sm:$0xff]  ;;  %v1235_v47 = vld [vmem:[#allocation7 + $0xec] ss:$16 sps:$4 sm:$0xff]   ;;  %514 = vmatprep.subr.bf16.mxu1 %v1231_v45  ;;  %v1237_v57 = vld [vmem:[#allocation7 + $0xc4] ss:$16 sps:$4 sm:$0xff]  }
  0x3e   :  { %1191 = vmatpush3.bf16.msra.mxu0 %v1224_v12  ;;  %v1236_v48 = vld [vmem:[#allocation7 + $0xe0] ss:$16 sps:$4 sm:$0xff]   ;;  %v1241_v58 = vld [vmem:[#allocation7 + $0xcc] ss:$16 sps:$4 sm:$0xff]   ;;  %v1239_v59 = vld [vmem:[#allocation7 + $0xc8] ss:$16 sps:$4 sm:$0xff]  }
  0x3f   :  { %1192 = vmatprep.subr.bf16.mxu0 %v1475_v3  ;;  %515 = vmatpush1.bf16.msra.mxu1 %v1236_v48  ;;  %v1242_v60 = vld [vmem:[#allocation7 + $0xc0] ss:$16 sps:$4 sm:$0xff]   ;;  %v1243_v61 = vld [vmem:[#allocation7 + $0xa4] ss:$16 sps:$4 sm:$0xff]   ;;  %v1247_v62 = vld [vmem:[#allocation7 + $0xac] ss:$16 sps:$4 sm:$0xff]  }
  0x40   :  { %516 = vmatprep.subr.bf16.mxu1 %v1237_v57  ;;  %v1245_v63 = vld [vmem:[#allocation7 + $0xa8] ss:$16 sps:$4 sm:$0xff]   ;;  %v1266_v12 = vld [vmem:[#allocation7 + $0x40] ss:$16 sps:$4 sm:$0xff]  }
  0x41   :  { %v1251_v2 = vld [vmem:[#allocation7 + $0x88] ss:$16 sps:$4 sm:$0xff]   ;;  %v1285_v45 = vld [vmem:[#allocation8 + $0x30] sm:$0xff]  }
  0x42   :  { %1193 = vmatpush3.bf16.msra.mxu0 %v1225_v13  ;;  %v1267_v13 = vld [vmem:[#allocation7 + $0x24] ss:$16 sps:$4 sm:$0xff]   ;;  %v1288_v48 = vld [vmem:[#allocation8 + $0xe8] sm:$0xff]   ;;  %v1297_v57 = vld [vmem:[#allocation8 + $0x18] sm:$0xff]  }
  0x43   :  { %1194 = vmatprep.subr.bf16.mxu0 %v1475_v3  ;;  %517 = vmatpush1.bf16.msra.mxu1 %v1242_v60  ;;  %v1300_v60 = vld [vmem:[#allocation8 + $0xd0] sm:$0xff]  }
  0x44   :  { %518 = vmatprep.subr.bf16.mxu1 %v1243_v61  ;;  %v1301_v61 = vld [vmem:[#allocation8 + $0x10] sm:$0xff]  }
  0x46   :  { %1195 = vmatpush3.bf16.msra.mxu0 %v1226_v14  ;;  %v1271_v14 = vld [vmem:[#allocation7 + $0x2c] ss:$16 sps:$4 sm:$0xff]  }
  0x47   :  { %1196 = vmatprep.subr.bf16.mxu0 %v1475_v3 }
  0x4a   :  { %1197 = vmatpush3.bf16.msra.mxu0 %v1227_v15  ;;  %v1477_v15 = vmov 0  }
  0x4b   :  { %1198 = vmatprep.subr.bf16.mxu0 %v1475_v3  ;;  %546 = vmatprep.mubr.bf16.mxu1 %v1477_v15 }
  0x4e   :  { %1199 = vmatpush3.bf16.msra.mxu0 %v1228_v16  ;;  %v1269_v16 = vld [vmem:[#allocation7 + $0x28] ss:$16 sps:$4 sm:$0xff]  }
  0x4f   :  { %1200 = vmatprep.subr.bf16.mxu0 %v1475_v3 }
  0x52   :  { %1201 = vmatpush3.bf16.msra.mxu0 %v1229_v17  ;;  %v1272_v17 = vld [vmem:[#allocation7 + $0x20] ss:$16 sps:$4 sm:$0xff]  }
  0x53   :  { %1202 = vmatprep.subr.bf16.mxu0 %v1475_v3  ;;  %v1253_v3 = vld [vmem:[#allocation7 + $0x8c] ss:$16 sps:$4 sm:$0xff]  }
  0x56   :  { %1203 = vmatpush3.bf16.msra.mxu0 %v1230_v18  ;;  %v1273_v18 = vld [vmem:[#allocation7 + $0x4] ss:$16 sps:$4 sm:$0xff]  }
  0x57   :  { %557 = vmatprep.subr.bf16.mxu0 %v1235_v47  ;;  %v1287_v47 = vld [vmem:[#allocation8 + $0x68] sm:$0xff]  }
  0xc2   :  { %v107_v4 = vpop.xlane.xlu0 %106 }
  0xc3   :  { %v111_v5 = vmul.f32 0.0078125, %v107_v4  ;;  %v1254_v4 = vld [vmem:[#allocation7 + $0x80] ss:$16 sps:$4 sm:$0xff]  }
  0xc5   :  { %v113_v6 = vsub.f32 %v1566_v0, %v111_v5  ;;  %v1255_v5 = vld [vmem:[#allocation7 + $0x64] ss:$16 sps:$4 sm:$0xff]  }
  0xc6   :  { %v109_v7 = vpop.xlane.xlu0 %108 }
  0xc7   :  { %v112_v8 = vmul.f32 0.0078125, %v109_v7  ;;  %v115_v9 = vmul.f32 %v113_v6, %v113_v6  ;;  %v1257_v7 = vld [vmem:[#allocation7 + $0x68] ss:$16 sps:$4 sm:$0xff]  }
  0xc9   :  { %v114_v10 = vsub.f32 %v1568_v1, %v112_v8  ;;  %117 = vadd.xlane.f32.xlu1 %v115_v9  ;;  %v1260_v8 = vld [vmem:[#allocation7 + $0x60] ss:$16 sps:$4 sm:$0xff]   ;;  %v1261_v9 = vld [vmem:[#allocation7 + $0x44] ss:$16 sps:$4 sm:$0xff]  }
  0xcb   :  { %v116_v11 = vmul.f32 %v114_v10, %v114_v10 }
  0xcd   :  { %119 = vadd.xlane.f32.xlu1 %v116_v11  ;;  %v1263_v11 = vld [vmem:[#allocation7 + $0x48] ss:$16 sps:$4 sm:$0xff]  }
 0x152   :  { %v118_v19 = vpop.xlane.xlu1 %117 }
 0x153   :  { %v121_v20 = vmul.f32 0.0078125, %v118_v19  ;;  %v1277_v19 = vld [vmem:[#allocation7 + $0xc] ss:$16 sps:$4 sm:$0xff]  }
 0x155   :  { %v123_v21 = vadd.f32 1e-05, %v121_v20  ;;  %v1275_v20 = vld [vmem:[#allocation7 + $0x8] ss:$16 sps:$4 sm:$0xff]  }
 0x156   :  { %v120_v22 = vpop.xlane.xlu1 %119 }
 0x157   :  { %1311 = vrsqrt.f32 %v123_v21  ;;  %v122_v23 = vmul.f32 0.0078125, %v120_v22  ;;  %v1278_v21 = vld [vmem:[#allocation7] ss:$16 sps:$4 sm:$0xff]  }
 0x159   :  { %v124_v24 = vadd.f32 1e-05, %v122_v23 }
 0x15b   :  { %1313 = vrsqrt.f32 %v124_v24 }
 0x164   :  { %v1312_v25 = vpop.eup %1311 }
 0x165   :  { %v127_v26 = vmul.f32 %v1312_v25, %v113_v6  ;;  %v1259_v6 = vld [vmem:[#allocation7 + $0x6c] ss:$16 sps:$4 sm:$0xff]  }
 0x167   :  { %v135_v30 = vmul.f32 %v1057_v27, %v127_v26 }
 0x168   :  { %v1314_v28 = vpop.eup %1313 }
 0x169   :  { %v128_v29 = vmul.f32 %v1314_v28, %v114_v10  ;;  %v143_v33 = vadd.f32 %v1058_v31, %v135_v30  ;;  %v1265_v10 = vld [vmem:[#allocation7 + $0x4c] ss:$16 sps:$4 sm:$0xff]   ;;  %v1068_v30 = vld [vmem:[%s1652_s5] ss:$0 sm:$0xff] }
 0x16b   :  { %v136_v32 = vmul.f32 %v1057_v27, %v128_v29 }
 0x16d   :  { %v144_v34 = vadd.f32 %v1058_v31, %v136_v32 }
 0x16f   :  { %v145_v35 = vpack.c.bf16 %v144_v34, %v143_v33  ;;  %v1069_v34 = vld [vmem:[%s1653_s6] ss:$0 sm:$0xff] }
 0x171   :  { %1205 = vmatmul.mubr.bf16.vlgmr.msra.gmra.mxu0 %v145_v35 }
 0x172   :  { %558 = vmatpush1.bf16.msra.mxu0 %v1233_v46  ;;  %589 = vmatprep.mubr.bf16.mxu0 %v1477_v15  ;;  %v1286_v46 = vld [vmem:[#allocation8 + $0xb0] sm:$0xff]  }
 0x173   :  { %559 = vmatprep.subr.bf16.mxu0 %v1241_v58  ;;  %v1298_v58 = vld [vmem:[#allocation8 + $0x98] sm:$0xff]  }
 0x176   :  { %560 = vmatpush1.bf16.msra.mxu0 %v1239_v59  ;;  %v1299_v59 = vld [vmem:[#allocation8 + $0x50] sm:$0xff]  }
 0x177   :  { %561 = vmatprep.subr.bf16.mxu0 %v1247_v62  ;;  %v1302_v62 = vld [vmem:[#allocation8 + $0x90] sm:$0xff]  }
 0x17a   :  { %562 = vmatpush1.bf16.msra.mxu0 %v1245_v63  ;;  %v1303_v63 = vld [vmem:[#allocation8 + $0x48] sm:$0xff]  }
 0x17b   :  { %563 = vmatprep.subr.bf16.mxu0 %v1253_v3  ;;  %v1307_v3 = vld [vmem:[#allocation8 + $0x40] sm:$0xff]  }
 0x17e   :  { %564 = vmatpush1.bf16.msra.mxu0 %v1251_v2  ;;  %v1306_v2 = vld [vmem:[#allocation8 + $0x88] sm:$0xff]  }
 0x17f   :  { %565 = vmatprep.subr.bf16.mxu0 %v1259_v6  ;;  %v1310_v6 = vld [vmem:[#allocation8 + $0x80] sm:$0xff]  }
 0x182   :  { %566 = vmatpush1.bf16.msra.mxu0 %v1257_v7  ;;  %v334_v7 = vlaneseq }
 0x183   :  { %567 = vmatprep.subr.bf16.mxu0 %v1265_v10 }
 0x186   :  { %568 = vmatpush1.bf16.msra.mxu0 %v1263_v11  ;;  %v332_v11 = vld [vmem:[%s1655_s8] sm:$0xf]  ;;  %s1478_s8 = smov [#allocation11]  }
 0x187   :  { %569 = vmatprep.subr.bf16.mxu0 %v1271_v14  ;;  %s1039_s16 = sshll.u32 %s1478_s8, 4  ;;  %s1040_s16 = int_to_ptr.vmem [resolvable:$true] %s1039_s16 }
 0x188   :  { %s1415_s3 = scalar_lea.vmem %s1040_s16, 256  ;;  %p1420_p7 = scmp.lt.s32.totalorder %s1040_s16, %s1040_s16 }
 0x189   :  { %p1416_p6 = scmp.ne.s32.totalorder %s1040_s16, %s1415_s3  ;;  %p1421_p8 = scmp.lt.s32.totalorder %s1415_s3, %s1415_s3 }
 0x18a   :  { %570 = vmatpush1.bf16.msra.mxu0 %v1269_v16 }
 0x18b   :  { %571 = vmatprep.subr.bf16.mxu0 %v1277_v19  ;;  %p1422_p9 = por %p1421_p8, %p1420_p7 }
 0x18d   :  { %p1423_p10 = pnand %p1422_p9, %p1416_p6 }
 0x18e   :  { %572 = vmatpush1.bf16.msra.mxu0 %v1275_v20 }
 0x231   :  { %v250_v37 = vpop.f32.mrf.mxu0 }
 0x232   :  { %v251_v38 = vadd.f32 %v1059_v36, %v250_v37 }
 0x233   :  { %v1206_v39 = vpop.f32.mrf.mxu0 }
 0x234   :  { %v257_v40 = vadd.f32 %v251_v38, %v1566_v0  ;;  %v1248_v0 = vld [vmem:[#allocation7 + $0xa0] ss:$16 sps:$4 sm:$0xff]   ;;  %v1279_v39 = vld [vmem:[#allocation8 + $0x78] sm:$0xff]  }
 0x235   :  { %v253_v41 = vpop.f32.mrf.mxu0  ;;  %519 = vmatpush1.bf16.msra.mxu1 %v1248_v0  ;;  %v1304_v0 = vld [vmem:[#allocation8 + $0xc8] sm:$0xff]  }
 0x236   :  { %259 = vst [vmem:[#allocation11] sm:$0xff] %v257_v40  ;;  %v254_v42 = vadd.f32 %v1059_v36, %v253_v41  ;;  %261 = vadd.xlane.f32.xlu0 %v257_v40  ;;  %v1281_v41 = vld [vmem:[#allocation8 + $0x38] sm:$0xff]  }
 0x237   :  { %v1207_v43 = vpop.f32.mrf.mxu0 }
 0x238   :  { %v258_v44 = vadd.f32 %v254_v42, %v1568_v1  ;;  %v1249_v1 = vld [vmem:[#allocation7 + $0x84] ss:$16 sps:$4 sm:$0xff]   ;;  %v1282_v42 = vld [vmem:[#allocation8 + $0xb8] sm:$0xff]  }
 0x239   :  { %520 = vmatprep.subr.bf16.mxu1 %v1249_v1  ;;  %v1283_v43 = vld [vmem:[#allocation8 + $0x70] sm:$0xff]   ;;  %v1305_v1 = vld [vmem:[#allocation8 + $0x8] sm:$0xff]  }
 0x23a   :  { %260 = vst [vmem:[#allocation11 + $0x8] sm:$0xff] %v258_v44  ;;  %263 = vadd.xlane.f32.xlu1 %v258_v44  ;;  %521 = vmatpush1.bf16.msra.mxu1 %v1254_v4  ;;  %v1308_v4 = vld [vmem:[#allocation8 + $0xc0] sm:$0xff]  }
 0x23b   :  { %522 = vmatprep.subr.bf16.mxu1 %v1255_v5  ;;  %v1309_v5 = vld [vmem:[#allocation8] sm:$0xff]  }
 0x23e   :  { %523 = vmatpush1.bf16.msra.mxu1 %v1260_v8  ;;  %v335_v8 = vshrl.u32 %v334_v7, 7 }
 0x23f   :  { %524 = vmatprep.subr.bf16.mxu1 %v1261_v9 }
 0x240   :  { %v336_v9 = vsub.s32 0, %v335_v8  ;;  %v344_v10 = vsub.s32 2, %v335_v8 }
 0x242   :  { %525 = vmatpush1.bf16.msra.mxu1 %v1266_v12  ;;  %v340_v12 = vsub.s32 1, %v335_v8  ;;  %v337_v14 = vrot.slane %v332_v11, %v336_v9  ;;  %v345_v15 = vrot.slane %v332_v11, %v344_v10 }
 0x243   :  { %526 = vmatprep.subr.bf16.mxu1 %v1267_v13  ;;  %v348_v13 = vsub.s32 3, %v335_v8 }
 0x244   :  { %v341_v16 = vrot.slane %v332_v11, %v340_v12 }
 0x246   :  { %527 = vmatpush1.bf16.msra.mxu1 %v1272_v17  ;;  %v349_v17 = vrot.slane %v332_v11, %v348_v13 }
 0x247   :  { %528 = vmatprep.subr.bf16.mxu1 %v1273_v18 }
 0x24a   :  { %529 = vmatpush1.bf16.msra.mxu1 %v1278_v21 }
 0x24b   :  { %1144 = vmatprep.subr.bf16.mxu1 %v1279_v39 }
 0x2bf   :  { %v262_v49 = vpop.xlane.xlu0 %261 }
 0x2c0   :  { %v265_v50 = vmul.f32 0.0078125, %v262_v49  ;;  %v1289_v49 = vld [vmem:[#allocation8 + $0x28] sm:$0xff]  }
 0x2c2   :  { %v1585_v51 = vsub.f32 %v257_v40, %v265_v50  ;;  %v1280_v40 = vld [vmem:[#allocation8 + $0xf8] sm:$0xff]   ;;  %v1290_v50 = vld [vmem:[#allocation8 + $0xa8] sm:$0xff]  }
 0x2c3   :  { %v264_v52 = vpop.xlane.xlu1 %263  ;;  %1166 = vmatprep.subr.bf16.mxu0 %v1280_v40 }
 0x2c4   :  { %v266_v53 = vmul.f32 0.0078125, %v264_v52  ;;  %v269_v54 = vmul.f32 %v1585_v51, %v1585_v51  ;;  %v1292_v52 = vld [vmem:[#allocation8 + $0xe0] sm:$0xff]  }
 0x2c6   :  { %v1589_v55 = vsub.f32 %v258_v44, %v266_v53  ;;  %271 = vadd.xlane.f32.xlu0 %v269_v54  ;;  %v1284_v44 = vld [vmem:[#allocation8 + $0xf0] sm:$0xff]   ;;  %v1293_v53 = vld [vmem:[#allocation8 + $0x20] sm:$0xff]  }
 0x2c7   :  { %v1294_v54 = vld [vmem:[#allocation8 + $0xa0] sm:$0xff]  }
 0x2c8   :  { %v270_v56 = vmul.f32 %v1589_v55, %v1589_v55 }
 0x2ca   :  { %273 = vadd.xlane.f32.xlu1 %v270_v56  ;;  %v1296_v56 = vld [vmem:[#allocation8 + $0xd8] sm:$0xff]  }
 0x34f   :  { %v272_v22 = vpop.xlane.xlu0 %271 }
 0x350   :  { %v275_v23 = vmul.f32 0.0078125, %v272_v22 }
 0x352   :  { %v277_v24 = vadd.f32 1e-05, %v275_v23 }
 0x353   :  { %v274_v25 = vpop.xlane.xlu1 %273 }
 0x354   :  { %1315 = vrsqrt.f32 %v277_v24  ;;  %v276_v26 = vmul.f32 0.0078125, %v274_v25 }
 0x356   :  { %v278_v27 = vadd.f32 1e-05, %v276_v26 }
 0x358   :  { %1317 = vrsqrt.f32 %v278_v27 }
 0x361   :  { %v1316_v28 = vpop.eup %1315 }
 0x362   :  { %v281_v29 = vmul.f32 %v1316_v28, %v1585_v51  ;;  %v1291_v51 = vld [vmem:[#allocation8 + $0x60] sm:$0xff]  }
 0x364   :  { %v289_v33 = vmul.f32 %v1068_v30, %v281_v29 }
 0x365   :  { %v1318_v31 = vpop.eup %1317 }
 0x366   :  { %v282_v32 = vmul.f32 %v1318_v31, %v1589_v55  ;;  %v297_v36 = vadd.f32 %v1069_v34, %v289_v33  ;;  %v1295_v55 = vld [vmem:[#allocation8 + $0x58] sm:$0xff]  }
 0x368   :  { %v290_v35 = vmul.f32 %v1068_v30, %v282_v32 }
 0x36a   :  { %v298_v37 = vadd.f32 %v1069_v34, %v290_v35 }
 0x36c   :  { %v299_v38 = vpack.c.bf16 %v298_v37, %v297_v36 }
 0x36e   :  { %547 = vmatmul.mubr.bf16.vlgmr.msra.gmra.mxu1 %v299_v38  ;;  %590 = vmatmul.mubr.bf16.vlgmr.msra.gmra.mxu0 %v299_v38 }
 0x36f   :  { %1145 = vmatpush3.bf16.msra.mxu1 %v1281_v41  ;;  %1167 = vmatpush3.bf16.msra.mxu0 %v1282_v42 }
 0x370   :  { %1146 = vmatprep.subr.bf16.mxu1 %v1283_v43  ;;  %1168 = vmatprep.subr.bf16.mxu0 %v1284_v44 }
 0x373   :  { %1147 = vmatpush3.bf16.msra.mxu1 %v1285_v45  ;;  %1169 = vmatpush3.bf16.msra.mxu0 %v1286_v46 }
 0x374   :  { %1148 = vmatprep.subr.bf16.mxu1 %v1287_v47  ;;  %1170 = vmatprep.subr.bf16.mxu0 %v1288_v48 }
 0x377   :  { %1149 = vmatpush3.bf16.msra.mxu1 %v1289_v49  ;;  %1171 = vmatpush3.bf16.msra.mxu0 %v1290_v50 }
 0x378   :  { %1150 = vmatprep.subr.bf16.mxu1 %v1291_v51  ;;  %1172 = vmatprep.subr.bf16.mxu0 %v1292_v52 }
 0x37b   :  { %1151 = vmatpush3.bf16.msra.mxu1 %v1293_v53  ;;  %1173 = vmatpush3.bf16.msra.mxu0 %v1294_v54 }
 0x37c   :  { %1152 = vmatprep.subr.bf16.mxu1 %v1295_v55  ;;  %1174 = vmatprep.subr.bf16.mxu0 %v1296_v56 }
 0x37f   :  { %1153 = vmatpush3.bf16.msra.mxu1 %v1297_v57  ;;  %1175 = vmatpush3.bf16.msra.mxu0 %v1298_v58 }
 0x380   :  { %1154 = vmatprep.subr.bf16.mxu1 %v1299_v59  ;;  %1176 = vmatprep.subr.bf16.mxu0 %v1300_v60 }
 0x383   :  { %1155 = vmatpush3.bf16.msra.mxu1 %v1301_v61  ;;  %1177 = vmatpush3.bf16.msra.mxu0 %v1302_v62 }
 0x384   :  { %1156 = vmatprep.subr.bf16.mxu1 %v1303_v63  ;;  %1178 = vmatprep.subr.bf16.mxu0 %v1304_v0 }
 0x387   :  { %1157 = vmatpush3.bf16.msra.mxu1 %v1305_v1  ;;  %1179 = vmatpush3.bf16.msra.mxu0 %v1306_v2 }
 0x388   :  { %1158 = vmatprep.subr.bf16.mxu1 %v1307_v3  ;;  %1180 = vmatprep.subr.bf16.mxu0 %v1308_v4 }
 0x38b   :  { %1159 = vmatpush3.bf16.msra.mxu1 %v1309_v5  ;;  %1181 = vmatpush3.bf16.msra.mxu0 %v1310_v6 }
 0x42e   :  { %v548_v18 = vpop.f32.mrf.mxu1  ;;  %v591_v19 = vpop.f32.mrf.mxu0 }
 0x42f   :  { %v1604_v20 = vadd.f32 %v548_v18, %v337_v14  ;;  %v1606_v21 = vadd.f32 %v591_v19, %v345_v15 }
 0x430   :  { %v550_v22 = vpop.f32.mrf.mxu1  ;;  %v593_v23 = vpop.f32.mrf.mxu0 }
 0x431   :  { %v608_v24 = vmul.f32 0.044715, %v1604_v20  ;;  %v610_v25 = vmul.f32 0.044715, %v1606_v21  ;;  %v551_v26 = vadd.f32 %v550_v22, %v341_v16  ;;  %v1610_v27 = vadd.f32 %v593_v23, %v349_v17 }
 0x432   :  { %v552_v28 = vpop.f32.mrf.mxu1  ;;  %v595_v29 = vpop.f32.mrf.mxu0  ;;  %v600_v18 = vmul.f32 0.5, %v1604_v20 }
 0x433   :  { %v616_v30 = vmul.f32 %v608_v24, %v1604_v20  ;;  %v618_v31 = vmul.f32 %v610_v25, %v1606_v21  ;;  %v609_v32 = vmul.f32 0.044715, %v551_v26  ;;  %v611_v33 = vmul.f32 0.044715, %v1610_v27 }
 0x434   :  { %v553_v34 = vadd.f32 %v552_v28, %v337_v14  ;;  %v1615_v35 = vadd.f32 %v595_v29, %v345_v15  ;;  %v554_v36 = vpop.f32.mrf.mxu1  ;;  %v597_v37 = vpop.f32.mrf.mxu0 }
 0x435   :  { %v624_v38 = vmul.f32 %v616_v30, %v1604_v20  ;;  %v626_v39 = vmul.f32 %v618_v31, %v1606_v21  ;;  %v617_v40 = vmul.f32 %v609_v32, %v551_v26  ;;  %v619_v41 = vmul.f32 %v611_v33, %v1610_v27 }
 0x436   :  { %v612_v42 = vmul.f32 0.044715, %v553_v34  ;;  %v614_v43 = vmul.f32 0.044715, %v1615_v35  ;;  %v555_v44 = vadd.f32 %v554_v36, %v341_v16  ;;  %v598_v45 = vadd.f32 %v597_v37, %v349_v17 }
 0x437   :  { %v632_v46 = vadd.f32 %v624_v38, %v1604_v20  ;;  %v634_v47 = vadd.f32 %v626_v39, %v1606_v21  ;;  %v625_v48 = vmul.f32 %v617_v40, %v551_v26  ;;  %v627_v49 = vmul.f32 %v619_v41, %v1610_v27 }
 0x438   :  { %v620_v50 = vmul.f32 %v612_v42, %v553_v34  ;;  %v622_v51 = vmul.f32 %v614_v43, %v1615_v35  ;;  %v613_v52 = vmul.f32 0.044715, %v555_v44  ;;  %v615_v53 = vmul.f32 0.044715, %v598_v45 }
 0x439   :  { %v640_v54 = vmul.f32 0.7978846, %v632_v46  ;;  %v642_v55 = vmul.f32 0.7978846, %v634_v47  ;;  %v633_v56 = vadd.f32 %v625_v48, %v551_v26  ;;  %v635_v62 = vadd.f32 %v627_v49, %v1610_v27 }
 0x43a   :  { %v628_v57 = vmul.f32 %v620_v50, %v553_v34  ;;  %v630_v58 = vmul.f32 %v622_v51, %v1615_v35  ;;  %v621_v59 = vmul.f32 %v613_v52, %v555_v44  ;;  %v623_v60 = vmul.f32 %v615_v53, %v598_v45 }
 0x43b   :  { %v641_v61 = vmul.f32 0.7978846, %v633_v56  ;;  %1319 = vtanh.f32 %v640_v54  ;;  %v643_v3 = vmul.f32 0.7978846, %v635_v62  ;;  %v601_v16 = vmul.f32 0.5, %v551_v26 }
 0x43c   :  { %v636_v63 = vadd.f32 %v628_v57, %v553_v34  ;;  %v638_v0 = vadd.f32 %v630_v58, %v1615_v35  ;;  %v629_v1 = vmul.f32 %v621_v59, %v555_v44  ;;  %1321 = vtanh.f32 %v642_v55 }
 0x43d   :  { %v631_v2 = vmul.f32 %v623_v60, %v598_v45  ;;  %1323 = vtanh.f32 %v641_v61  ;;  %v604_v24 = vmul.f32 0.5, %v553_v34  ;;  %v605_v30 = vmul.f32 0.5, %v555_v44 }
 0x43e   :  { %v644_v4 = vmul.f32 0.7978846, %v636_v63  ;;  %v646_v5 = vmul.f32 0.7978846, %v638_v0  ;;  %v637_v6 = vadd.f32 %v629_v1, %v555_v44  ;;  %1325 = vtanh.f32 %v643_v3 }
 0x43f   :  { %v639_v7 = vadd.f32 %v631_v2, %v598_v45  ;;  %v606_v32 = vmul.f32 0.5, %v1615_v35  ;;  %v603_v36 = vmul.f32 0.5, %v1610_v27  ;;  %v607_v37 = vmul.f32 0.5, %v598_v45 }
 0x440   :  { %1327 = vtanh.f32 %v644_v4  ;;  %v645_v8 = vmul.f32 0.7978846, %v637_v6  ;;  %v602_v20 = vmul.f32 0.5, %v1606_v21 }
 0x441   :  { %1329 = vtanh.f32 %v646_v5  ;;  %v647_v9 = vmul.f32 0.7978846, %v639_v7 }
 0x442   :  { %1331 = vtanh.f32 %v645_v8 }
 0x443   :  { %1333 = vtanh.f32 %v647_v9 }
 0x448   :  { %v1320_v10 = vpop.eup %1319 }
 0x449   :  { %v1322_v11 = vpop.eup %1321  ;;  %v656_v25 = vadd.f32 1.0, %v1320_v10 }
 0x44a   :  { %v1324_v12 = vpop.eup %1323  ;;  %v658_v33 = vadd.f32 1.0, %v1322_v11 }
 0x44b   :  { %v1326_v13 = vpop.eup %1325  ;;  %v657_v17 = vadd.f32 1.0, %v1324_v12  ;;  %v664_v43 = vmul.f32 %v656_v25, %v600_v18 }
 0x44c   :  { %v659_v23 = vadd.f32 1.0, %v1326_v13  ;;  %v666_v47 = vmul.f32 %v658_v33, %v602_v20 }
 0x44d   :  { %v1328_v14 = vpop.eup %1327  ;;  %v665_v39 = vmul.f32 %v657_v17, %v601_v16 }
 0x44e   :  { %v1330_v15 = vpop.eup %1329  ;;  %v660_v19 = vadd.f32 1.0, %v1328_v14  ;;  %v667_v42 = vmul.f32 %v659_v23, %v603_v36 }
 0x44f   :  { %v1332_v22 = vpop.eup %1331  ;;  %v662_v28 = vadd.f32 1.0, %v1330_v15 }
 0x450   :  { %v1334_v29 = vpop.eup %1333  ;;  %v661_v31 = vadd.f32 1.0, %v1332_v22  ;;  %v668_v26 = vmul.f32 %v660_v19, %v604_v24 }
 0x451   :  { %v663_v38 = vadd.f32 1.0, %v1334_v29  ;;  %v670_v41 = vmul.f32 %v662_v28, %v606_v32 }
 0x452   :  { %v669_v40 = vmul.f32 %v661_v31, %v605_v30  ;;  %v672_v48 = vpack.c.bf16 %v668_v26, %v664_v43 }
 0x453   :  { %v671_v34 = vmul.f32 %v663_v38, %v607_v37  ;;  %v674_v35 = vpack.c.bf16 %v670_v41, %v666_v47 }
 0x454   :  { %v673_v46 = vpack.c.bf16 %v669_v40, %v665_v39 }
 0x455   :  { %v675_v44 = vpack.c.bf16 %v671_v34, %v667_v42 }
 0x456   :  { %970 = vmatprep.mubr.bf16.mxu1 %v673_v46 }
 0x457   :  { %1011 = vmatprep.mubr.bf16.mxu0 %v675_v44  ;;  %971 = vmatmul.mubr.bf16.vlgmr.msra.gmra.mxu1 %v672_v48 }
 0x458   :  { %1012 = vmatmul.mubr.bf16.vlgmr.msra.gmra.mxu0 %v674_v35 }
 0x459   :  { %1426 = shalt.err (!%p1423_p10)
}
 0x45a   :  { %1045 = dma.vmem_to_hbm [thread:$0]  %s1040_s16, 256, %s1659_s12, [#allocation12], %s1469_s13, %s1469_s13, %s1470_s14  }
 0x45b   :  { %v1102_v45 = vld [vmem:[%s1657_s10] ss:$0 sm:$0xff]  ;;  %s1479_s21 = smov [#allocation10]  }
 0x45c   :  { %s1027_s22 = sshll.u32 %s1479_s21, 4  ;;  %s1028_s22 = int_to_ptr.vmem [resolvable:$true] %s1027_s22 }
 0x45d   :  { %s1435_s10 = scalar_lea.vmem %s1028_s22, 256  ;;  %p1440_p12 = scmp.lt.s32.totalorder %s1028_s22, %s1028_s22 }
 0x45e   :  { %p1436_p11 = scmp.ne.s32.totalorder %s1028_s22, %s1435_s10  ;;  %p1441_p13 = scmp.lt.s32.totalorder %s1435_s10, %s1435_s10 }
 0x460   :  { %p1442_p0 = por %p1441_p13, %p1440_p12 }
 0x462   :  { %p1443_p1 = pnand %p1442_p0, %p1436_p11 }
 0x517   :  { %v1160_v21 = vpop.f32.mrf.mxu1 }
 0x518   :  { %v1182_v27 = vpop.f32.mrf.mxu0 }
 0x519   :  { %v1161_v49 = vpop.f32.mrf.mxu1 }
 0x51a   :  { %v1162_v50 = vadd.f32 %v1161_v49, %v1160_v21  ;;  %v1183_v51 = vpop.f32.mrf.mxu0 }
 0x51b   :  { %v1163_v52 = vpop.f32.mrf.mxu1  ;;  %v1184_v54 = vadd.f32 %v1183_v51, %v1182_v27 }
 0x51c   :  { %v973_v53 = vadd.f32 %v1162_v50, %v1102_v45  ;;  %v1185_v55 = vpop.f32.mrf.mxu0 }
 0x51d   :  { %v1164_v56 = vpop.f32.mrf.mxu1 }
 0x51e   :  { %v1014_v57 = vadd.f32 %v1184_v54, %v973_v53  ;;  %v1165_v58 = vadd.f32 %v1164_v56, %v1163_v52  ;;  %v1186_v59 = vpop.f32.mrf.mxu0 }
 0x51f   :  { %v1187_v61 = vadd.f32 %v1186_v59, %v1185_v55 }
 0x520   :  { %1020 = vst [vmem:[#allocation10] sm:$0xff] %v1014_v57  ;;  %v976_v60 = vadd.f32 %v1165_v58, %v1102_v45 }
 0x522   :  { %v1017_v62 = vadd.f32 %v1187_v61, %v976_v60 }
 0x524   :  { %1021 = vst [vmem:[#allocation10 + $0x8] sm:$0xff] %v1017_v62 }
 0x525   :  { %1446 = shalt.err (!%p1443_p1)
}
 0x526   :  { %1033 = dma.vmem_to_hbm [thread:$0]  %s1028_s22, 256, %s1658_s11, [#allocation4], %s1469_s13, %s1469_s13, %s1470_s14  }
 0x527   :  { %1461 = dma.done.wait [#allocation4], 256  }
 0x528   :  { %1462 = vsyncadd [#allocation4], 4294967040 }
 0x529   :  { %1463 = dma.done.wait [#allocation12], 256  }
 0x52a   :  { %1464 = vsyncadd [#allocation12], 4294967040 }
 0x52b   :  { %1052 = vsyncpa [#allocation3], 1 }
 0x52c   :  { %1053 = vsyncpa [#allocation6], 1 }
 0x52d   :  { %1054 = vsyncpa [#allocation9], 1 }
 0x52e   :  { %1055 = vsyncpa [#allocation4], 1 }
 0x52f   :  { %1056 = vsyncpa [#allocation12], 1 }

</bundles_post_ra>
